<compile_context>
chip_gen: v6e
topology: v6e:2x2x1
jax: 0.10.0
libtpu: 0.0.40
codegen_flags: <defaults>
</compile_context>

<pallas_src>
import functools

import jax
import jax.numpy as jnp
from jax.experimental import pallas as pl
from jax.experimental.pallas import tpu as pltpu

_EPS = 1e-5
_VMEM_LIMIT = 64 * 1024 * 1024


# -----------------------------------------------------------------------------
# Static helpers (tile selection, interpolation matrices)
# -----------------------------------------------------------------------------
def _pick_block(total, target):
    """Largest divisor of `total` that is <= target (>= 1)."""
    target = max(1, min(target, total))
    for b in range(target, 0, -1):
        if total % b == 0:
            return b
    return 1


def _row_block(rows, target):
    """Divisor of `rows` that is a multiple of 8 (or the full extent)."""
    if rows <= target:
        return rows
    for d in range(min(target, rows), 7, -1):
        if rows % d == 0 and d % 8 == 0:
            return d
    return rows


def _lane_tile(n, max_tile=4096):
    """Full extent if small, else a multiple-of-128 divisor of n."""
    if n <= max_tile:
        return n
    for t in range(max_tile, 127, -128):
        if n % t == 0:
            return t
    return n


def _interp_matrix(out_size, in_size):
    """(out_size, in_size) bilinear interpolation matrix, align_corners=True."""
    if out_size == 1:
        return jnp.eye(1, in_size, dtype=jnp.float32)
    if in_size == 1:
        return jnp.ones((out_size, 1), jnp.float32)
    src = jnp.arange(out_size, dtype=jnp.float32) * (in_size - 1) / (out_size - 1)
    lo = jnp.clip(jnp.floor(src), 0, in_size - 1)
    hi = jnp.minimum(lo + 1, in_size - 1)
    f = src - lo
    oh_lo = jax.nn.one_hot(lo.astype(jnp.int32), in_size, dtype=jnp.float32)
    oh_hi = jax.nn.one_hot(hi.astype(jnp.int32), in_size, dtype=jnp.float32)
    return oh_lo * (1.0 - f)[:, None] + oh_hi * f[:, None]


# -----------------------------------------------------------------------------
# Kernel 1: bilinear 2x upsample (align_corners=True), batched & lane-dense.
# -----------------------------------------------------------------------------
def _up_kron_kernel(x_ref, kt_ref, o_ref):
    # (rb, HW) @ (HW, 4*HW): one lane-dense MXU matmul for a block of images.
    o_ref[...] = jnp.dot(x_ref[...], kt_ref[...], preferred_element_type=jnp.float32)


def _up_batched_kernel(x_ref, ah_ref, awt_ref, o_ref):
    # Batched separable upsample for large images: Ah @ img @ Aw^T per image.
    b = x_ref.shape[0]
    ah = jnp.broadcast_to(ah_ref[...], (b,) + ah_ref.shape)
    awt = jnp.broadcast_to(awt_ref[...], (b,) + awt_ref.shape)
    t = jnp.einsum("boh,bhw->bow", ah, x_ref[...], preferred_element_type=jnp.float32)
    o_ref[...] = jnp.einsum("bow,bwv->bov", t, awt, preferred_element_type=jnp.float32)


def bilinear_upsample_2x(x, *, kron_max_hw=512):
    """x: (N, C, H, W) f32 -> (N, C, 2H, 2W) f32, align_corners=True."""
    n, c, h, w = x.shape
    ho, wo = 2 * h, 2 * w
    nc = n * c
    ah = _interp_matrix(ho, h)
    aw = _interp_matrix(wo, w)

    if h * w <= kron_max_hw:
        # Small images: a single (NC, HW) @ kron(Ah, Aw)^T matmul; output last
        # dim is 4*HW (multiple of 128 for HW >= 32) -> unmasked stores.
        kt = jnp.einsum("Oh,Pw->hwOP", ah, aw).reshape(h * w, ho * wo)
        rb = _row_block(nc, 512)
        out = pl.pallas_call(
            _up_kron_kernel,
            grid=(nc // rb,),
            out_shape=jax.ShapeDtypeStruct((nc, ho * wo), jnp.float32),
            in_specs=[pl.BlockSpec((rb, h * w), lambda i: (i, 0)),
                      pl.BlockSpec((h * w, ho * wo), lambda i: (0, 0))],
            out_specs=pl.BlockSpec((rb, ho * wo), lambda i: (i, 0)),
            compiler_params=pltpu.CompilerParams(
                dimension_semantics=("parallel",),
                vmem_limit_bytes=_VMEM_LIMIT),
        )(x.reshape(nc, h * w), kt)
        return out.reshape(n, c, ho, wo)

    # Large images (kron matrix would be too big): batched two-pass kernel.
    b = _pick_block(nc, 8)
    out = pl.pallas_call(
        _up_batched_kernel,
        grid=(nc // b,),
        out_shape=jax.ShapeDtypeStruct((nc, ho, wo), jnp.float32),
        in_specs=[pl.BlockSpec((b, h, w), lambda i: (i, 0, 0)),
                  pl.BlockSpec((ho, h), lambda i: (0, 0)),
                  pl.BlockSpec((w, wo), lambda i: (0, 0))],
        out_specs=pl.BlockSpec((b, ho, wo), lambda i: (i, 0, 0)),
        compiler_params=pltpu.CompilerParams(
            dimension_semantics=("parallel",),
            vmem_limit_bytes=_VMEM_LIMIT),
    )(x.reshape(nc, h, w), ah, aw.T)
    return out.reshape(n, c, ho, wo)


# -----------------------------------------------------------------------------
# Kernel 2: 3x3 conv (padding=1, bias=False) with in-VMEM tap generation,
# optional fused input-side BatchNorm+ReLU, and fused BN batch-stat partials.
#
# Input layout per image: flattened H-padded "slab" of length
#     L = H*W + 2*W + 2  =  [1 zero][W-zero top row][H*W data][W-zero bottom row][1 zero]
# Tap (dy, dx) for output position p is slab[p + (1+dy)*W + dx + 1]; dx = +-1
# taps additionally need a column mask (row-wrap positions zeroed).
# -----------------------------------------------------------------------------
def _conv3x3_kernel(x_ref, colmask_ref, intmask_ref, w_ref, scale_ref, shift_ref,
                    out_ref, psum_ref, psq_ref, *, width, hw, fuse_bn, pad_out):
    slab = x_ref[0]                                            # (Cin, L) bf16
    if fuse_bn:
        # Previous layer's BatchNorm + ReLU applied on the fly; re-zero the
        # padding lanes afterwards (relu(shift) != 0 there).
        act = jnp.maximum(slab.astype(jnp.float32) * scale_ref[...] + shift_ref[...], 0.0)
        slab = (act * intmask_ref[...]).astype(jnp.bfloat16)
    else:
        slab = slab.astype(jnp.bfloat16)

    cm_left = colmask_ref[0:1, :].astype(jnp.bfloat16)         # (1, HW)
    cm_right = colmask_ref[1:2, :].astype(jnp.bfloat16)        # (1, HW)

    acc = None
    t = 0
    for dy in (-1, 0, 1):
        for dx in (-1, 0, 1):
            base = (1 + dy) * width + dx + 1                   # static lane offset
            tap = slab[:, base:base + hw]                      # (Cin, HW) bf16
            if dx == -1:
                tap = tap * cm_left
            elif dx == 1:
                tap = tap * cm_right
            d = jnp.dot(w_ref[t], tap, preferred_element_type=jnp.float32)
            acc = d if acc is None else acc + d
            t += 1

    # BN batch-stat partials of the raw conv output (one tiny store per image).
    psum_ref[0] = jnp.sum(acc, axis=1, keepdims=True)          # (Cout, 1)
    psq_ref[0] = jnp.sum(acc * acc, axis=1, keepdims=True)     # (Cout, 1)

    if pad_out:
        # Emit directly in padded-slab layout so the next conv needs no glue pass.
        out_ref[0] = jnp.zeros(out_ref.shape[1:], out_ref.dtype)
        out_ref[0, :, width + 1: width + 1 + hw] = acc.astype(out_ref.dtype)
    else:
        out_ref[0] = acc.astype(out_ref.dtype)


def conv3x3_bn_in(x_slab, colmask, intmask, w_oihw, scale_in, shift_in, *,
                  height, width, fuse_bn, pad_out):
    """x_slab: (N, Cin, L) bf16; returns (out bf16, psum f32, psq f32)."""
    n, cin, l = x_slab.shape
    hw = height * width
    assert l == hw + 2 * width + 2
    cout = w_oihw.shape[0]
    # (Cout, Cin, 3, 3) -> (9, Cout, Cin), tap index t = kh*3 + kw.
    w9 = jnp.transpose(w_oihw, (2, 3, 0, 1)).reshape(9, cout, cin).astype(jnp.bfloat16)
    l_out = l if pad_out else hw

    kern = functools.partial(_conv3x3_kernel, width=width, hw=hw,
                             fuse_bn=fuse_bn, pad_out=pad_out)
    # TODO(synk): for very large Cin*H*W (deep v7x levels) add row/HW tiling with
    # halo slabs + a K-tiled f32 accumulator; one whole image per step here.
    # TODO(synk): pipeline_mode=pl.Buffered(1) on the constant weight spec would
    # save one VMEM weight copy on v7x.
    return pl.pallas_call(
        kern,
        grid=(n,),
        out_shape=(jax.ShapeDtypeStruct((n, cout, l_out), jnp.bfloat16),
                   jax.ShapeDtypeStruct((n, cout, 1), jnp.float32),
                   jax.ShapeDtypeStruct((n, cout, 1), jnp.float32)),
        in_specs=[pl.BlockSpec((1, cin, l), lambda i: (i, 0, 0)),
                  pl.BlockSpec((2, hw), lambda i: (0, 0)),
                  pl.BlockSpec((1, l), lambda i: (0, 0)),
                  pl.BlockSpec((9, cout, cin), lambda i: (0, 0, 0)),
                  pl.BlockSpec((cin, 1), lambda i: (0, 0)),
                  pl.BlockSpec((cin, 1), lambda i: (0, 0))],
        out_specs=(pl.BlockSpec((1, cout, l_out), lambda i: (i, 0, 0)),
                   pl.BlockSpec((1, cout, 1), lambda i: (i, 0, 0)),
                   pl.BlockSpec((1, cout, 1), lambda i: (i, 0, 0))),
        compiler_params=pltpu.CompilerParams(
            dimension_semantics=("parallel",),
            vmem_limit_bytes=_VMEM_LIMIT),
    )(x_slab, colmask, intmask, w9, scale_in[:, None], shift_in[:, None])


def _bn_affine(psum, psq, gamma, beta, *, count):
    """Training-mode BatchNorm2d affine (batch stats, biased variance)."""
    tot = jnp.sum(psum, axis=0)[:, 0]
    totsq = jnp.sum(psq, axis=0)[:, 0]
    mean = tot / count
    # Single-pass E[x^2]-E[x]^2, clamped (cancellation guard for activation data).
    var = jnp.maximum(totsq / count - mean * mean, 0.0)
    scale = gamma * jax.lax.rsqrt(var + _EPS)
    shift = beta - mean * scale
    return scale, shift


# -----------------------------------------------------------------------------
# Kernel 3: final BatchNorm + ReLU, N and C folded into one row axis so blocks
# are large and lane-dense (per-row scale/shift broadcast over lanes).
# -----------------------------------------------------------------------------
def _bn_relu_kernel(x_ref, scale_ref, shift_ref, o_ref):
    o_ref[...] = jnp.maximum(
        x_ref[...].astype(jnp.float32) * scale_ref[...] + shift_ref[...], 0.0)


def batchnorm_relu_rows(x_rows, scale_rows, shift_rows):
    """x_rows: (N*C, HW) bf16; scale/shift: (N*C,) f32 -> (N*C, HW) f32."""
    rows, hw = x_rows.shape
    rb = _row_block(rows, 256)
    t = _lane_tile(hw, 4096)
    return pl.pallas_call(
        _bn_relu_kernel,
        grid=(rows // rb, hw // t),
        out_shape=jax.ShapeDtypeStruct((rows, hw), jnp.float32),
        in_specs=[pl.BlockSpec((rb, t), lambda i, j: (i, j)),
                  pl.BlockSpec((rb, 1), lambda i, j: (i, 0)),
                  pl.BlockSpec((rb, 1), lambda i, j: (i, 0))],
        out_specs=pl.BlockSpec((rb, t), lambda i, j: (i, j)),
        compiler_params=pltpu.CompilerParams(
            dimension_semantics=("parallel", "parallel"),
            vmem_limit_bytes=_VMEM_LIMIT),
    )(x_rows, scale_rows[:, None], shift_rows[:, None])


# -----------------------------------------------------------------------------
# Module wiring (Up = upsample -> pad -> concat -> DoubleConv), NCHW throughout.
# -----------------------------------------------------------------------------
def _to_slab(x_nchw):
    """(N, C, H, W) -> flattened H-padded slab (N, C, H*W + 2*W + 2), bf16."""
    n, c, h, w = x_nchw.shape
    xp = jnp.pad(x_nchw, ((0, 0), (0, 0), (1, 1), (0, 0)))
    xf = xp.reshape(n, c, (h + 2) * w)
    return jnp.pad(xf, ((0, 0), (0, 0), (1, 1))).astype(jnp.bfloat16)


def init_up_params(key, in_channels, out_channels):
    mid = in_channels // 2
    k1, k2 = jax.random.split(key)
    return dict(
        w1=jax.random.normal(k1, (mid, in_channels, 3, 3), jnp.float32) * 0.1,   # OIHW
        g1=jnp.ones((mid,), jnp.float32),
        b1=jnp.zeros((mid,), jnp.float32),
        w2=jax.random.normal(k2, (out_channels, mid, 3, 3), jnp.float32) * 0.1,  # OIHW
        g2=jnp.ones((out_channels,), jnp.float32),
        b2=jnp.zeros((out_channels,), jnp.float32),
    )


def up_forward(params, x1_nchw, x2_nchw):
    x1 = x1_nchw.astype(jnp.float32)
    x2 = x2_nchw.astype(jnp.float32)

    # 2x bilinear upsample (align_corners=True) then pad to the skip's size.
    x1u = bilinear_upsample_2x(x1)
    dy = x2.shape[2] - x1u.shape[2]
    dx = x2.shape[3] - x1u.shape[3]
    # TODO(synk): negative dy/dx (F.pad cropping) not handled; standard UNet has dy, dx >= 0.
    x1u = jnp.pad(x1u, ((0, 0), (0, 0), (dy // 2, dy - dy // 2),
                        (dx // 2, dx - dx // 2)))

    # torch.cat([x2, x1], dim=1) + one cheap XLA layout pass into the padded
    # slab layout for conv1 (the 9x im2col materialization is gone).
    x = jnp.concatenate([x2, x1u], axis=1)
    n, cin, h, w = x.shape
    hw = h * w
    slab0 = _to_slab(x)

    # Column masks for the dx = -1 / +1 taps and the slab-interior mask.
    col = jnp.arange(hw, dtype=jnp.int32) % w
    colmask = jnp.stack([(col != 0), (col != w - 1)], axis=0).astype(jnp.float32)
    intmask = jnp.pad(jnp.ones((1, hw), jnp.float32), ((0, 0), (w + 1, w + 1)))

    cout = params["w2"].shape[0]

    # conv1 (raw): bf16 output already in padded-slab layout + BN partials.
    h1slab, s1, q1 = conv3x3_bn_in(
        slab0, colmask, intmask, params["w1"],
        jnp.ones((cin,), jnp.float32), jnp.zeros((cin,), jnp.float32),
        height=h, width=w, fuse_bn=False, pad_out=True)
    scale1, shift1 = _bn_affine(s1, q1, params["g1"], params["b1"], count=n * hw)

    # conv2 with conv1's BatchNorm+ReLU fused into the tap construction.
    h2raw, s2, q2 = conv3x3_bn_in(
        h1slab, colmask, intmask, params["w2"], scale1, shift1,
        height=h, width=w, fuse_bn=True, pad_out=False)
    scale2, shift2 = _bn_affine(s2, q2, params["g2"], params["b2"], count=n * hw)

    # Final BN+ReLU: fold N and C into the row axis (large, lane-dense blocks).
    out = batchnorm_relu_rows(h2raw.reshape(n * cout, hw),
                              jnp.tile(scale2, n), jnp.tile(shift2, n))
    return out.reshape(n, cout, h, w)   # NCHW, matches the PyTorch module


if __name__ == "__main__":
    key = jax.random.PRNGKey(0)
    kx1, kx2, kp = jax.random.split(key, 3)

    in_channels, out_channels, n = 8, 4, 2
    # x1: deep feature (half spatial res), x2: skip connection (full res);
    # channels of x1 + x2 must equal in_channels (they are concatenated).
    x1 = jax.random.normal(kx1, (n, in_channels // 2, 8, 8), jnp.float32)
    x2 = jax.random.normal(kx2, (n, in_channels - in_channels // 2, 16, 16), jnp.float32)
    params = init_up_params(kp, in_channels, out_channels)

    out = jax.jit(functools.partial(up_forward, params))(x1, x2)
    jax.block_until_ready(out)
    assert out.shape == (n, out_channels, 16, 16), out.shape
    assert bool(jnp.all(jnp.isfinite(out)))
    print("KERNEL_OK")
</pallas_src>

<mosaic_0001>
module attributes {stable_mosaic.version = 11 : i64} {
  func.func @_up_kron_kernel(%arg0: i32, %arg1: memref<8x64xf32, #tpu.memory_space<vmem>>, %arg2: memref<64x256xf32, #tpu.memory_space<vmem>>, %arg3: memref<8x256xf32, #tpu.memory_space<vmem>>) attributes {dimension_semantics = [#tpu.dimension_semantics<parallel>], iteration_bounds = array<i64: 1>, scalar_prefetch = 0 : i64, scratch_operands = 0 : i64, tpu.core_type = #tpu.core_type<tc>, window_params = [{transform_indices = @transform_0, window_bounds = array<i64: 8, 64>}, {pipeline_mode = #tpu.pipeline_mode<synchronous>, transform_indices = @transform_1, window_bounds = array<i64: 64, 256>}, {transform_indices = @transform_2, window_bounds = array<i64: 8, 256>}]} {
    %c0 = arith.constant 0 : index
    %c0_0 = arith.constant 0 : index
    %0 = vector.load %arg1[%c0, %c0_0] : memref<8x64xf32, #tpu.memory_space<vmem>>, vector<8x64xf32>
    %c0_1 = arith.constant 0 : index
    %c0_2 = arith.constant 0 : index
    %1 = vector.load %arg2[%c0_1, %c0_2] : memref<64x256xf32, #tpu.memory_space<vmem>>, vector<64x256xf32>
    %cst = arith.constant dense<0.000000e+00> : vector<8x256xf32>
    %2 = tpu.matmul %0, %1, %cst {dimension_numbers = #tpu.dot_dimension_numbers<[1], [0], [0], [1], [0, 0, 1, 1], [], []>} : vector<8x64xf32>, vector<64x256xf32>, vector<8x256xf32> -> vector<8x256xf32>
    %c0_3 = arith.constant 0 : index
    %c0_4 = arith.constant 0 : index
    %3 = vector.load %arg3[%c0_3, %c0_4] : memref<8x256xf32, #tpu.memory_space<vmem>>, vector<8x256xf32>
    tpu.vector_store %arg3[%c0_3, %c0_4], %2 {strides = array<i32>} : memref<8x256xf32, #tpu.memory_space<vmem>>, vector<8x256xf32>,
    return
  }
  func.func @transform_0(%arg0: i32) -> (i32, i32) {
    %c0_i32 = arith.constant 0 : i32
    %c0_i32_0 = arith.constant 0 : i32
    return %arg0, %c0_i32 : i32, i32
  }
  func.func @transform_1(%arg0: i32) -> (i32, i32) {
    %c0_i32 = arith.constant 0 : i32
    %c0_i32_0 = arith.constant 0 : i32
    %c0_i32_1 = arith.constant 0 : i32
    return %c0_i32, %c0_i32_0 : i32, i32
  }
  func.func @transform_2(%arg0: i32) -> (i32, i32) {
    %c0_i32 = arith.constant 0 : i32
    %c0_i32_0 = arith.constant 0 : i32
    return %arg0, %c0_i32 : i32, i32
  }
}

module attributes {stable_mosaic.version = 11 : i64} {
  func.func @_conv3x3_kernel(%arg0: i32, %arg1: memref<1x8x290xbf16, #tpu.memory_space<vmem>>, %arg2: memref<2x256xf32, #tpu.memory_space<vmem>>, %arg3: memref<1x290xf32, #tpu.memory_space<vmem>>, %arg4: memref<9x4x8xbf16, #tpu.memory_space<vmem>>, %arg5: memref<8x1xf32, #tpu.memory_space<vmem>>, %arg6: memref<8x1xf32, #tpu.memory_space<vmem>>, %arg7: memref<1x4x290xbf16, #tpu.memory_space<vmem>>, %arg8: memref<1x4x1xf32, #tpu.memory_space<vmem>>, %arg9: memref<1x4x1xf32, #tpu.memory_space<vmem>>) attributes {dimension_semantics = [#tpu.dimension_semantics<parallel>], iteration_bounds = array<i64: 2>, scalar_prefetch = 0 : i64, scratch_operands = 0 : i64, tpu.core_type = #tpu.core_type<tc>, window_params = [{transform_indices = @transform_0, window_bounds = array<i64: 1, 8, 290>}, {pipeline_mode = #tpu.pipeline_mode<synchronous>, transform_indices = @transform_1, window_bounds = array<i64: 2, 256>}, {pipeline_mode = #tpu.pipeline_mode<synchronous>, transform_indices = @transform_2, window_bounds = array<i64: 1, 290>}, {pipeline_mode = #tpu.pipeline_mode<synchronous>, transform_indices = @transform_3, window_bounds = array<i64: 9, 4, 8>}, {pipeline_mode = #tpu.pipeline_mode<synchronous>, transform_indices = @transform_4, window_bounds = array<i64: 8, 1>}, {pipeline_mode = #tpu.pipeline_mode<synchronous>, transform_indices = @transform_5, window_bounds = array<i64: 8, 1>}, {transform_indices = @transform_6, window_bounds = array<i64: 1, 4, 290>}, {transform_indices = @transform_7, window_bounds = array<i64: 1, 4, 1>}, {transform_indices = @transform_8, window_bounds = array<i64: 1, 4, 1>}]} {
    %c0 = arith.constant 0 : index
    %c0_0 = arith.constant 0 : index
    %c0_1 = arith.constant 0 : index
    %0 = vector.load %arg1[%c0, %c0_0, %c0_1] : memref<1x8x290xbf16, #tpu.memory_space<vmem>>, vector<1x8x290xbf16>
    %1 = vector.shape_cast %0 : vector<1x8x290xbf16> to vector<8x290xbf16>
    %c0_2 = arith.constant 0 : index
    %c0_3 = arith.constant 0 : index
    %2 = vector.load %arg2[%c0_2, %c0_3] : memref<2x256xf32, #tpu.memory_space<vmem>>, vector<1x256xf32>
    %3 = arith.truncf %2 : vector<1x256xf32> to vector<1x256xbf16>
    %c1 = arith.constant 1 : index
    %c0_4 = arith.constant 0 : index
    %4 = vector.load %arg2[%c1, %c0_4] : memref<2x256xf32, #tpu.memory_space<vmem>>, vector<1x256xf32>
    %5 = arith.truncf %4 : vector<1x256xf32> to vector<1x256xbf16>
    %6 = vector.extract_strided_slice %1 {offsets = [0, 0], sizes = [8, 256], strides = [1, 1]} : vector<8x290xbf16> to vector<8x256xbf16>
    %7 = vector.broadcast %3 : vector<1x256xbf16> to vector<8x256xbf16>
    %8 = arith.mulf %6, %7 : vector<8x256xbf16>
    %c0_5 = arith.constant 0 : index
    %c0_6 = arith.constant 0 : index
    %c0_7 = arith.constant 0 : index
    %9 = vector.load %arg4[%c0_5, %c0_6, %c0_7] : memref<9x4x8xbf16, #tpu.memory_space<vmem>>, vector<1x4x8xbf16>
    %10 = vector.shape_cast %9 : vector<1x4x8xbf16> to vector<4x8xbf16>
    %cst = arith.constant dense<0.000000e+00> : vector<4x256xf32>
    %11 = tpu.matmul %10, %8, %cst {dimension_numbers = #tpu.dot_dimension_numbers<[1], [0], [0], [1], [0, 0, 1, 1], [], []>} : vector<4x8xbf16>, vector<8x256xbf16>, vector<4x256xf32> -> vector<4x256xf32>
    %12 = vector.extract_strided_slice %1 {offsets = [0, 1], sizes = [8, 256], strides = [1, 1]} : vector<8x290xbf16> to vector<8x256xbf16>
    %c1_8 = arith.constant 1 : index
    %c0_9 = arith.constant 0 : index
    %c0_10 = arith.constant 0 : index
    %13 = vector.load %arg4[%c1_8, %c0_9, %c0_10] : memref<9x4x8xbf16, #tpu.memory_space<vmem>>, vector<1x4x8xbf16>
    %14 = vector.shape_cast %13 : vector<1x4x8xbf16> to vector<4x8xbf16>
    %cst_11 = arith.constant dense<0.000000e+00> : vector<4x256xf32>
    %15 = tpu.matmul %14, %12, %cst_11 {dimension_numbers = #tpu.dot_dimension_numbers<[1], [0], [0], [1], [0, 0, 1, 1], [], []>} : vector<4x8xbf16>, vector<8x256xbf16>, vector<4x256xf32> -> vector<4x256xf32>
    %16 = arith.addf %11, %15 : vector<4x256xf32>
    %17 = vector.extract_strided_slice %1 {offsets = [0, 2], sizes = [8, 256], strides = [1, 1]} : vector<8x290xbf16> to vector<8x256xbf16>
    %18 = vector.broadcast %5 : vector<1x256xbf16> to vector<8x256xbf16>
    %19 = arith.mulf %17, %18 : vector<8x256xbf16>
    %c2 = arith.constant 2 : index
    %c0_12 = arith.constant 0 : index
    %c0_13 = arith.constant 0 : index
    %20 = vector.load %arg4[%c2, %c0_12, %c0_13] : memref<9x4x8xbf16, #tpu.memory_space<vmem>>, vector<1x4x8xbf16>
    %21 = vector.shape_cast %20 : vector<1x4x8xbf16> to vector<4x8xbf16>
    %cst_14 = arith.constant dense<0.000000e+00> : vector<4x256xf32>
    %22 = tpu.matmul %21, %19, %cst_14 {dimension_numbers = #tpu.dot_dimension_numbers<[1], [0], [0], [1], [0, 0, 1, 1], [], []>} : vector<4x8xbf16>, vector<8x256xbf16>, vector<4x256xf32> -> vector<4x256xf32>
    %23 = arith.addf %16, %22 : vector<4x256xf32>
    %24 = vector.extract_strided_slice %1 {offsets = [0, 16], sizes = [8, 256], strides = [1, 1]} : vector<8x290xbf16> to vector<8x256xbf16>
    %25 = vector.broadcast %3 : vector<1x256xbf16> to vector<8x256xbf16>
    %26 = arith.mulf %24, %25 : vector<8x256xbf16>
    %c3 = arith.constant 3 : index
    %c0_15 = arith.constant 0 : index
    %c0_16 = arith.constant 0 : index
    %27 = vector.load %arg4[%c3, %c0_15, %c0_16] : memref<9x4x8xbf16, #tpu.memory_space<vmem>>, vector<1x4x8xbf16>
    %28 = vector.shape_cast %27 : vector<1x4x8xbf16> to vector<4x8xbf16>
    %cst_17 = arith.constant dense<0.000000e+00> : vector<4x256xf32>
    %29 = tpu.matmul %28, %26, %cst_17 {dimension_numbers = #tpu.dot_dimension_numbers<[1], [0], [0], [1], [0, 0, 1, 1], [], []>} : vector<4x8xbf16>, vector<8x256xbf16>, vector<4x256xf32> -> vector<4x256xf32>
    %30 = arith.addf %23, %29 : vector<4x256xf32>
    %31 = vector.extract_strided_slice %1 {offsets = [0, 17], sizes = [8, 256], strides = [1, 1]} : vector<8x290xbf16> to vector<8x256xbf16>
    %c4 = arith.constant 4 : index
    %c0_18 = arith.constant 0 : index
    %c0_19 = arith.constant 0 : index
    %32 = vector.load %arg4[%c4, %c0_18, %c0_19] : memref<9x4x8xbf16, #tpu.memory_space<vmem>>, vector<1x4x8xbf16>
    %33 = vector.shape_cast %32 : vector<1x4x8xbf16> to vector<4x8xbf16>
    %cst_20 = arith.constant dense<0.000000e+00> : vector<4x256xf32>
    %34 = tpu.matmul %33, %31, %cst_20 {dimension_numbers = #tpu.dot_dimension_numbers<[1], [0], [0], [1], [0, 0, 1, 1], [], []>} : vector<4x8xbf16>, vector<8x256xbf16>, vector<4x256xf32> -> vector<4x256xf32>
    %35 = arith.addf %30, %34 : vector<4x256xf32>
    %36 = vector.extract_strided_slice %1 {offsets = [0, 18], sizes = [8, 256], strides = [1, 1]} : vector<8x290xbf16> to vector<8x256xbf16>
    %37 = vector.broadcast %5 : vector<1x256xbf16> to vector<8x256xbf16>
    %38 = arith.mulf %36, %37 : vector<8x256xbf16>
    %c5 = arith.constant 5 : index
    %c0_21 = arith.constant 0 : index
    %c0_22 = arith.constant 0 : index
    %39 = vector.load %arg4[%c5, %c0_21, %c0_22] : memref<9x4x8xbf16, #tpu.memory_space<vmem>>, vector<1x4x8xbf16>
    %40 = vector.shape_cast %39 : vector<1x4x8xbf16> to vector<4x8xbf16>
    %cst_23 = arith.constant dense<0.000000e+00> : vector<4x256xf32>
    %41 = tpu.matmul %40, %38, %cst_23 {dimension_numbers = #tpu.dot_dimension_numbers<[1], [0], [0], [1], [0, 0, 1, 1], [], []>} : vector<4x8xbf16>, vector<8x256xbf16>, vector<4x256xf32> -> vector<4x256xf32>
    %42 = arith.addf %35, %41 : vector<4x256xf32>
    %43 = vector.extract_strided_slice %1 {offsets = [0, 32], sizes = [8, 256], strides = [1, 1]} : vector<8x290xbf16> to vector<8x256xbf16>
    %44 = vector.broadcast %3 : vector<1x256xbf16> to vector<8x256xbf16>
    %45 = arith.mulf %43, %44 : vector<8x256xbf16>
    %c6 = arith.constant 6 : index
    %c0_24 = arith.constant 0 : index
    %c0_25 = arith.constant 0 : index
    %46 = vector.load %arg4[%c6, %c0_24, %c0_25] : memref<9x4x8xbf16, #tpu.memory_space<vmem>>, vector<1x4x8xbf16>
    %47 = vector.shape_cast %46 : vector<1x4x8xbf16> to vector<4x8xbf16>
    %cst_26 = arith.constant dense<0.000000e+00> : vector<4x256xf32>
    %48 = tpu.matmul %47, %45, %cst_26 {dimension_numbers = #tpu.dot_dimension_numbers<[1], [0], [0], [1], [0, 0, 1, 1], [], []>} : vector<4x8xbf16>, vector<8x256xbf16>, vector<4x256xf32> -> vector<4x256xf32>
    %49 = arith.addf %42, %48 : vector<4x256xf32>
    %50 = vector.extract_strided_slice %1 {offsets = [0, 33], sizes = [8, 256], strides = [1, 1]} : vector<8x290xbf16> to vector<8x256xbf16>
    %c7 = arith.constant 7 : index
    %c0_27 = arith.constant 0 : index
    %c0_28 = arith.constant 0 : index
    %51 = vector.load %arg4[%c7, %c0_27, %c0_28] : memref<9x4x8xbf16, #tpu.memory_space<vmem>>, vector<1x4x8xbf16>
    %52 = vector.shape_cast %51 : vector<1x4x8xbf16> to vector<4x8xbf16>
    %cst_29 = arith.constant dense<0.000000e+00> : vector<4x256xf32>
    %53 = tpu.matmul %52, %50, %cst_29 {dimension_numbers = #tpu.dot_dimension_numbers<[1], [0], [0], [1], [0, 0, 1, 1], [], []>} : vector<4x8xbf16>, vector<8x256xbf16>, vector<4x256xf32> -> vector<4x256xf32>
    %54 = arith.addf %49, %53 : vector<4x256xf32>
    %55 = vector.extract_strided_slice %1 {offsets = [0, 34], sizes = [8, 256], strides = [1, 1]} : vector<8x290xbf16> to vector<8x256xbf16>
    %56 = vector.broadcast %5 : vector<1x256xbf16> to vector<8x256xbf16>
    %57 = arith.mulf %55, %56 : vector<8x256xbf16>
    %c8 = arith.constant 8 : index
    %c0_30 = arith.constant 0 : index
    %c0_31 = arith.constant 0 : index
    %58 = vector.load %arg4[%c8, %c0_30, %c0_31] : memref<9x4x8xbf16, #tpu.memory_space<vmem>>, vector<1x4x8xbf16>
    %59 = vector.shape_cast %58 : vector<1x4x8xbf16> to vector<4x8xbf16>
    %cst_32 = arith.constant dense<0.000000e+00> : vector<4x256xf32>
    %60 = tpu.matmul %59, %57, %cst_32 {dimension_numbers = #tpu.dot_dimension_numbers<[1], [0], [0], [1], [0, 0, 1, 1], [], []>} : vector<4x8xbf16>, vector<8x256xbf16>, vector<4x256xf32> -> vector<4x256xf32>
    %61 = arith.addf %54, %60 : vector<4x256xf32>
    %cst_33 = arith.constant dense<0.000000e+00> : vector<4xf32>
    %62 = vector.multi_reduction <add>, %61, %cst_33 [1] : vector<4x256xf32> to vector<4xf32>
    %63 = vector.shape_cast %62 : vector<4xf32> to vector<4x1xf32>
    %c0_34 = arith.constant 0 : index
    %c0_35 = arith.constant 0 : index
    %c0_36 = arith.constant 0 : index
    %64 = vector.load %arg8[%c0_34, %c0_35, %c0_36] : memref<1x4x1xf32, #tpu.memory_space<vmem>>, vector<1x4x1xf32>
    %65 = vector.shape_cast %64 : vector<1x4x1xf32> to vector<4x1xf32>
    %66 = vector.shape_cast %63 : vector<4x1xf32> to vector<1x4x1xf32>
    tpu.vector_store %arg8[%c0_34, %c0_35, %c0_36], %66 {strides = array<i32>} : memref<1x4x1xf32, #tpu.memory_space<vmem>>, vector<1x4x1xf32>,
    %67 = arith.mulf %61, %61 : vector<4x256xf32>
    %cst_37 = arith.constant dense<0.000000e+00> : vector<4xf32>
    %68 = vector.multi_reduction <add>, %67, %cst_37 [1] : vector<4x256xf32> to vector<4xf32>
    %69 = vector.shape_cast %68 : vector<4xf32> to vector<4x1xf32>
    %c0_38 = arith.constant 0 : index
    %c0_39 = arith.constant 0 : index
    %c0_40 = arith.constant 0 : index
    %70 = vector.load %arg9[%c0_38, %c0_39, %c0_40] : memref<1x4x1xf32, #tpu.memory_space<vmem>>, vector<1x4x1xf32>
    %71 = vector.shape_cast %70 : vector<1x4x1xf32> to vector<4x1xf32>
    %72 = vector.shape_cast %69 : vector<4x1xf32> to vector<1x4x1xf32>
    tpu.vector_store %arg9[%c0_38, %c0_39, %c0_40], %72 {strides = array<i32>} : memref<1x4x1xf32, #tpu.memory_space<vmem>>, vector<1x4x1xf32>,
    %cst_41 = arith.constant 0.000000e+00 : bf16
    %73 = vector.broadcast %cst_41 : bf16 to vector<4x290xbf16>
    %c0_42 = arith.constant 0 : index
    %c0_43 = arith.constant 0 : index
    %c0_44 = arith.constant 0 : index
    %74 = vector.load %arg7[%c0_42, %c0_43, %c0_44] : memref<1x4x290xbf16, #tpu.memory_space<vmem>>, vector<1x4x290xbf16>
    %75 = vector.shape_cast %74 : vector<1x4x290xbf16> to vector<4x290xbf16>
    %76 = vector.shape_cast %73 : vector<4x290xbf16> to vector<1x4x290xbf16>
    tpu.vector_store %arg7[%c0_42, %c0_43, %c0_44], %76 {strides = array<i32>} : memref<1x4x290xbf16, #tpu.memory_space<vmem>>, vector<1x4x290xbf16>,
    %77 = arith.truncf %61 : vector<4x256xf32> to vector<4x256xbf16>
    %c0_45 = arith.constant 0 : index
    %c0_46 = arith.constant 0 : index
    %c17 = arith.constant 17 : index
    %78 = vector.load %arg7[%c0_45, %c0_46, %c17] : memref<1x4x290xbf16, #tpu.memory_space<vmem>>, vector<1x4x256xbf16>
    %79 = vector.shape_cast %78 : vector<1x4x256xbf16> to vector<4x256xbf16>
    %80 = vector.shape_cast %77 : vector<4x256xbf16> to vector<1x4x256xbf16>
    tpu.vector_store %arg7[%c0_45, %c0_46, %c17], %80 {strides = array<i32>} : memref<1x4x290xbf16, #tpu.memory_space<vmem>>, vector<1x4x256xbf16>,
    return
  }
  func.func @transform_0(%arg0: i32) -> (i32, i32, i32) {
    %c0_i32 = arith.constant 0 : i32
    %c0_i32_0 = arith.constant 0 : i32
    %c0_i32_1 = arith.constant 0 : i32
    return %arg0, %c0_i32, %c0_i32_0 : i32, i32, i32
  }
  func.func @transform_1(%arg0: i32) -> (i32, i32) {
    %c0_i32 = arith.constant 0 : i32
    %c0_i32_0 = arith.constant 0 : i32
    %c0_i32_1 = arith.constant 0 : i32
    return %c0_i32, %c0_i32_0 : i32, i32
  }
  func.func @transform_2(%arg0: i32) -> (i32, i32) {
    %c0_i32 = arith.constant 0 : i32
    %c0_i32_0 = arith.constant 0 : i32
    %c0_i32_1 = arith.constant 0 : i32
    return %c0_i32, %c0_i32_0 : i32, i32
  }
  func.func @transform_3(%arg0: i32) -> (i32, i32, i32) {
    %c0_i32 = arith.constant 0 : i32
    %c0_i32_0 = arith.constant 0 : i32
    %c0_i32_1 = arith.constant 0 : i32
    %c0_i32_2 = arith.constant 0 : i32
    return %c0_i32, %c0_i32_0, %c0_i32_1 : i32, i32, i32
  }
  func.func @transform_4(%arg0: i32) -> (i32, i32) {
    %c0_i32 = arith.constant 0 : i32
    %c0_i32_0 = arith.constant 0 : i32
    %c0_i32_1 = arith.constant 0 : i32
    return %c0_i32, %c0_i32_0 : i32, i32
  }
  func.func @transform_5(%arg0: i32) -> (i32, i32) {
    %c0_i32 = arith.constant 0 : i32
    %c0_i32_0 = arith.constant 0 : i32
    %c0_i32_1 = arith.constant 0 : i32
    return %c0_i32, %c0_i32_0 : i32, i32
  }
  func.func @transform_6(%arg0: i32) -> (i32, i32, i32) {
    %c0_i32 = arith.constant 0 : i32
    %c0_i32_0 = arith.constant 0 : i32
    %c0_i32_1 = arith.constant 0 : i32
    return %arg0, %c0_i32, %c0_i32_0 : i32, i32, i32
  }
  func.func @transform_7(%arg0: i32) -> (i32, i32, i32) {
    %c0_i32 = arith.constant 0 : i32
    %c0_i32_0 = arith.constant 0 : i32
    %c0_i32_1 = arith.constant 0 : i32
    return %arg0, %c0_i32, %c0_i32_0 : i32, i32, i32
  }
  func.func @transform_8(%arg0: i32) -> (i32, i32, i32) {
    %c0_i32 = arith.constant 0 : i32
    %c0_i32_0 = arith.constant 0 : i32
    %c0_i32_1 = arith.constant 0 : i32
    return %arg0, %c0_i32, %c0_i32_0 : i32, i32, i32
  }
}

module attributes {stable_mosaic.version = 11 : i64} {
  func.func @_conv3x3_kernel(%arg0: i32, %arg1: memref<1x4x290xbf16, #tpu.memory_space<vmem>>, %arg2: memref<2x256xf32, #tpu.memory_space<vmem>>, %arg3: memref<1x290xf32, #tpu.memory_space<vmem>>, %arg4: memref<9x4x4xbf16, #tpu.memory_space<vmem>>, %arg5: memref<4x1xf32, #tpu.memory_space<vmem>>, %arg6: memref<4x1xf32, #tpu.memory_space<vmem>>, %arg7: memref<1x4x256xbf16, #tpu.memory_space<vmem>>, %arg8: memref<1x4x1xf32, #tpu.memory_space<vmem>>, %arg9: memref<1x4x1xf32, #tpu.memory_space<vmem>>) attributes {dimension_semantics = [#tpu.dimension_semantics<parallel>], iteration_bounds = array<i64: 2>, scalar_prefetch = 0 : i64, scratch_operands = 0 : i64, tpu.core_type = #tpu.core_type<tc>, window_params = [{transform_indices = @transform_0, window_bounds = array<i64: 1, 4, 290>}, {pipeline_mode = #tpu.pipeline_mode<synchronous>, transform_indices = @transform_1, window_bounds = array<i64: 2, 256>}, {pipeline_mode = #tpu.pipeline_mode<synchronous>, transform_indices = @transform_2, window_bounds = array<i64: 1, 290>}, {pipeline_mode = #tpu.pipeline_mode<synchronous>, transform_indices = @transform_3, window_bounds = array<i64: 9, 4, 4>}, {pipeline_mode = #tpu.pipeline_mode<synchronous>, transform_indices = @transform_4, window_bounds = array<i64: 4, 1>}, {pipeline_mode = #tpu.pipeline_mode<synchronous>, transform_indices = @transform_5, window_bounds = array<i64: 4, 1>}, {transform_indices = @transform_6, window_bounds = array<i64: 1, 4, 256>}, {transform_indices = @transform_7, window_bounds = array<i64: 1, 4, 1>}, {transform_indices = @transform_8, window_bounds = array<i64: 1, 4, 1>}]} {
    %c0 = arith.constant 0 : index
    %c0_0 = arith.constant 0 : index
    %c0_1 = arith.constant 0 : index
    %0 = vector.load %arg1[%c0, %c0_0, %c0_1] : memref<1x4x290xbf16, #tpu.memory_space<vmem>>, vector<1x4x290xbf16>
    %1 = vector.shape_cast %0 : vector<1x4x290xbf16> to vector<4x290xbf16>
    %2 = arith.extf %1 : vector<4x290xbf16> to vector<4x290xf32>
    %c0_2 = arith.constant 0 : index
    %c0_3 = arith.constant 0 : index
    %3 = vector.load %arg5[%c0_2, %c0_3] : memref<4x1xf32, #tpu.memory_space<vmem>>, vector<4x1xf32>
    %4 = vector.broadcast %3 : vector<4x1xf32> to vector<4x290xf32>
    %5 = arith.mulf %2, %4 : vector<4x290xf32>
    %c0_4 = arith.constant 0 : index
    %c0_5 = arith.constant 0 : index
    %6 = vector.load %arg6[%c0_4, %c0_5] : memref<4x1xf32, #tpu.memory_space<vmem>>, vector<4x1xf32>
    %7 = vector.broadcast %6 : vector<4x1xf32> to vector<4x290xf32>
    %8 = arith.addf %5, %7 : vector<4x290xf32>
    %cst = arith.constant 0.000000e+00 : f32
    %9 = vector.broadcast %cst : f32 to vector<4x290xf32>
    %10 = arith.maximumf %8, %9 : vector<4x290xf32>
    %c0_6 = arith.constant 0 : index
    %c0_7 = arith.constant 0 : index
    %11 = vector.load %arg3[%c0_6, %c0_7] : memref<1x290xf32, #tpu.memory_space<vmem>>, vector<1x290xf32>
    %12 = vector.broadcast %11 : vector<1x290xf32> to vector<4x290xf32>
    %13 = arith.mulf %10, %12 : vector<4x290xf32>
    %14 = arith.truncf %13 : vector<4x290xf32> to vector<4x290xbf16>
    %c0_8 = arith.constant 0 : index
    %c0_9 = arith.constant 0 : index
    %15 = vector.load %arg2[%c0_8, %c0_9] : memref<2x256xf32, #tpu.memory_space<vmem>>, vector<1x256xf32>
    %16 = arith.truncf %15 : vector<1x256xf32> to vector<1x256xbf16>
    %c1 = arith.constant 1 : index
    %c0_10 = arith.constant 0 : index
    %17 = vector.load %arg2[%c1, %c0_10] : memref<2x256xf32, #tpu.memory_space<vmem>>, vector<1x256xf32>
    %18 = arith.truncf %17 : vector<1x256xf32> to vector<1x256xbf16>
    %19 = vector.extract_strided_slice %14 {offsets = [0, 0], sizes = [4, 256], strides = [1, 1]} : vector<4x290xbf16> to vector<4x256xbf16>
    %20 = vector.broadcast %16 : vector<1x256xbf16> to vector<4x256xbf16>
    %21 = arith.mulf %19, %20 : vector<4x256xbf16>
    %c0_11 = arith.constant 0 : index
    %c0_12 = arith.constant 0 : index
    %c0_13 = arith.constant 0 : index
    %22 = vector.load %arg4[%c0_11, %c0_12, %c0_13] : memref<9x4x4xbf16, #tpu.memory_space<vmem>>, vector<1x4x4xbf16>
    %23 = vector.shape_cast %22 : vector<1x4x4xbf16> to vector<4x4xbf16>
    %cst_14 = arith.constant dense<0.000000e+00> : vector<4x256xf32>
    %24 = tpu.matmul %23, %21, %cst_14 {dimension_numbers = #tpu.dot_dimension_numbers<[1], [0], [0], [1], [0, 0, 1, 1], [], []>} : vector<4x4xbf16>, vector<4x256xbf16>, vector<4x256xf32> -> vector<4x256xf32>
    %25 = vector.extract_strided_slice %14 {offsets = [0, 1], sizes = [4, 256], strides = [1, 1]} : vector<4x290xbf16> to vector<4x256xbf16>
    %c1_15 = arith.constant 1 : index
    %c0_16 = arith.constant 0 : index
    %c0_17 = arith.constant 0 : index
    %26 = vector.load %arg4[%c1_15, %c0_16, %c0_17] : memref<9x4x4xbf16, #tpu.memory_space<vmem>>, vector<1x4x4xbf16>
    %27 = vector.shape_cast %26 : vector<1x4x4xbf16> to vector<4x4xbf16>
    %cst_18 = arith.constant dense<0.000000e+00> : vector<4x256xf32>
    %28 = tpu.matmul %27, %25, %cst_18 {dimension_numbers = #tpu.dot_dimension_numbers<[1], [0], [0], [1], [0, 0, 1, 1], [], []>} : vector<4x4xbf16>, vector<4x256xbf16>, vector<4x256xf32> -> vector<4x256xf32>
    %29 = arith.addf %24, %28 : vector<4x256xf32>
    %30 = vector.extract_strided_slice %14 {offsets = [0, 2], sizes = [4, 256], strides = [1, 1]} : vector<4x290xbf16> to vector<4x256xbf16>
    %31 = vector.broadcast %18 : vector<1x256xbf16> to vector<4x256xbf16>
    %32 = arith.mulf %30, %31 : vector<4x256xbf16>
    %c2 = arith.constant 2 : index
    %c0_19 = arith.constant 0 : index
    %c0_20 = arith.constant 0 : index
    %33 = vector.load %arg4[%c2, %c0_19, %c0_20] : memref<9x4x4xbf16, #tpu.memory_space<vmem>>, vector<1x4x4xbf16>
    %34 = vector.shape_cast %33 : vector<1x4x4xbf16> to vector<4x4xbf16>
    %cst_21 = arith.constant dense<0.000000e+00> : vector<4x256xf32>
    %35 = tpu.matmul %34, %32, %cst_21 {dimension_numbers = #tpu.dot_dimension_numbers<[1], [0], [0], [1], [0, 0, 1, 1], [], []>} : vector<4x4xbf16>, vector<4x256xbf16>, vector<4x256xf32> -> vector<4x256xf32>
    %36 = arith.addf %29, %35 : vector<4x256xf32>
    %37 = vector.extract_strided_slice %14 {offsets = [0, 16], sizes = [4, 256], strides = [1, 1]} : vector<4x290xbf16> to vector<4x256xbf16>
    %38 = vector.broadcast %16 : vector<1x256xbf16> to vector<4x256xbf16>
    %39 = arith.mulf %37, %38 : vector<4x256xbf16>
    %c3 = arith.constant 3 : index
    %c0_22 = arith.constant 0 : index
    %c0_23 = arith.constant 0 : index
    %40 = vector.load %arg4[%c3, %c0_22, %c0_23] : memref<9x4x4xbf16, #tpu.memory_space<vmem>>, vector<1x4x4xbf16>
    %41 = vector.shape_cast %40 : vector<1x4x4xbf16> to vector<4x4xbf16>
    %cst_24 = arith.constant dense<0.000000e+00> : vector<4x256xf32>
    %42 = tpu.matmul %41, %39, %cst_24 {dimension_numbers = #tpu.dot_dimension_numbers<[1], [0], [0], [1], [0, 0, 1, 1], [], []>} : vector<4x4xbf16>, vector<4x256xbf16>, vector<4x256xf32> -> vector<4x256xf32>
    %43 = arith.addf %36, %42 : vector<4x256xf32>
    %44 = vector.extract_strided_slice %14 {offsets = [0, 17], sizes = [4, 256], strides = [1, 1]} : vector<4x290xbf16> to vector<4x256xbf16>
    %c4 = arith.constant 4 : index
    %c0_25 = arith.constant 0 : index
    %c0_26 = arith.constant 0 : index
    %45 = vector.load %arg4[%c4, %c0_25, %c0_26] : memref<9x4x4xbf16, #tpu.memory_space<vmem>>, vector<1x4x4xbf16>
    %46 = vector.shape_cast %45 : vector<1x4x4xbf16> to vector<4x4xbf16>
    %cst_27 = arith.constant dense<0.000000e+00> : vector<4x256xf32>
    %47 = tpu.matmul %46, %44, %cst_27 {dimension_numbers = #tpu.dot_dimension_numbers<[1], [0], [0], [1], [0, 0, 1, 1], [], []>} : vector<4x4xbf16>, vector<4x256xbf16>, vector<4x256xf32> -> vector<4x256xf32>
    %48 = arith.addf %43, %47 : vector<4x256xf32>
    %49 = vector.extract_strided_slice %14 {offsets = [0, 18], sizes = [4, 256], strides = [1, 1]} : vector<4x290xbf16> to vector<4x256xbf16>
    %50 = vector.broadcast %18 : vector<1x256xbf16> to vector<4x256xbf16>
    %51 = arith.mulf %49, %50 : vector<4x256xbf16>
    %c5 = arith.constant 5 : index
    %c0_28 = arith.constant 0 : index
    %c0_29 = arith.constant 0 : index
    %52 = vector.load %arg4[%c5, %c0_28, %c0_29] : memref<9x4x4xbf16, #tpu.memory_space<vmem>>, vector<1x4x4xbf16>
    %53 = vector.shape_cast %52 : vector<1x4x4xbf16> to vector<4x4xbf16>
    %cst_30 = arith.constant dense<0.000000e+00> : vector<4x256xf32>
    %54 = tpu.matmul %53, %51, %cst_30 {dimension_numbers = #tpu.dot_dimension_numbers<[1], [0], [0], [1], [0, 0, 1, 1], [], []>} : vector<4x4xbf16>, vector<4x256xbf16>, vector<4x256xf32> -> vector<4x256xf32>
    %55 = arith.addf %48, %54 : vector<4x256xf32>
    %56 = vector.extract_strided_slice %14 {offsets = [0, 32], sizes = [4, 256], strides = [1, 1]} : vector<4x290xbf16> to vector<4x256xbf16>
    %57 = vector.broadcast %16 : vector<1x256xbf16> to vector<4x256xbf16>
    %58 = arith.mulf %56, %57 : vector<4x256xbf16>
    %c6 = arith.constant 6 : index
    %c0_31 = arith.constant 0 : index
    %c0_32 = arith.constant 0 : index
    %59 = vector.load %arg4[%c6, %c0_31, %c0_32] : memref<9x4x4xbf16, #tpu.memory_space<vmem>>, vector<1x4x4xbf16>
    %60 = vector.shape_cast %59 : vector<1x4x4xbf16> to vector<4x4xbf16>
    %cst_33 = arith.constant dense<0.000000e+00> : vector<4x256xf32>
    %61 = tpu.matmul %60, %58, %cst_33 {dimension_numbers = #tpu.dot_dimension_numbers<[1], [0], [0], [1], [0, 0, 1, 1], [], []>} : vector<4x4xbf16>, vector<4x256xbf16>, vector<4x256xf32> -> vector<4x256xf32>
    %62 = arith.addf %55, %61 : vector<4x256xf32>
    %63 = vector.extract_strided_slice %14 {offsets = [0, 33], sizes = [4, 256], strides = [1, 1]} : vector<4x290xbf16> to vector<4x256xbf16>
    %c7 = arith.constant 7 : index
    %c0_34 = arith.constant 0 : index
    %c0_35 = arith.constant 0 : index
    %64 = vector.load %arg4[%c7, %c0_34, %c0_35] : memref<9x4x4xbf16, #tpu.memory_space<vmem>>, vector<1x4x4xbf16>
    %65 = vector.shape_cast %64 : vector<1x4x4xbf16> to vector<4x4xbf16>
    %cst_36 = arith.constant dense<0.000000e+00> : vector<4x256xf32>
    %66 = tpu.matmul %65, %63, %cst_36 {dimension_numbers = #tpu.dot_dimension_numbers<[1], [0], [0], [1], [0, 0, 1, 1], [], []>} : vector<4x4xbf16>, vector<4x256xbf16>, vector<4x256xf32> -> vector<4x256xf32>
    %67 = arith.addf %62, %66 : vector<4x256xf32>
    %68 = vector.extract_strided_slice %14 {offsets = [0, 34], sizes = [4, 256], strides = [1, 1]} : vector<4x290xbf16> to vector<4x256xbf16>
    %69 = vector.broadcast %18 : vector<1x256xbf16> to vector<4x256xbf16>
    %70 = arith.mulf %68, %69 : vector<4x256xbf16>
    %c8 = arith.constant 8 : index
    %c0_37 = arith.constant 0 : index
    %c0_38 = arith.constant 0 : index
    %71 = vector.load %arg4[%c8, %c0_37, %c0_38] : memref<9x4x4xbf16, #tpu.memory_space<vmem>>, vector<1x4x4xbf16>
    %72 = vector.shape_cast %71 : vector<1x4x4xbf16> to vector<4x4xbf16>
    %cst_39 = arith.constant dense<0.000000e+00> : vector<4x256xf32>
    %73 = tpu.matmul %72, %70, %cst_39 {dimension_numbers = #tpu.dot_dimension_numbers<[1], [0], [0], [1], [0, 0, 1, 1], [], []>} : vector<4x4xbf16>, vector<4x256xbf16>, vector<4x256xf32> -> vector<4x256xf32>
    %74 = arith.addf %67, %73 : vector<4x256xf32>
    %cst_40 = arith.constant dense<0.000000e+00> : vector<4xf32>
    %75 = vector.multi_reduction <add>, %74, %cst_40 [1] : vector<4x256xf32> to vector<4xf32>
    %76 = vector.shape_cast %75 : vector<4xf32> to vector<4x1xf32>
    %c0_41 = arith.constant 0 : index
    %c0_42 = arith.constant 0 : index
    %c0_43 = arith.constant 0 : index
    %77 = vector.load %arg8[%c0_41, %c0_42, %c0_43] : memref<1x4x1xf32, #tpu.memory_space<vmem>>, vector<1x4x1xf32>
    %78 = vector.shape_cast %77 : vector<1x4x1xf32> to vector<4x1xf32>
    %79 = vector.shape_cast %76 : vector<4x1xf32> to vector<1x4x1xf32>
    tpu.vector_store %arg8[%c0_41, %c0_42, %c0_43], %79 {strides = array<i32>} : memref<1x4x1xf32, #tpu.memory_space<vmem>>, vector<1x4x1xf32>,
    %80 = arith.mulf %74, %74 : vector<4x256xf32>
    %cst_44 = arith.constant dense<0.000000e+00> : vector<4xf32>
    %81 = vector.multi_reduction <add>, %80, %cst_44 [1] : vector<4x256xf32> to vector<4xf32>
    %82 = vector.shape_cast %81 : vector<4xf32> to vector<4x1xf32>
    %c0_45 = arith.constant 0 : index
    %c0_46 = arith.constant 0 : index
    %c0_47 = arith.constant 0 : index
    %83 = vector.load %arg9[%c0_45, %c0_46, %c0_47] : memref<1x4x1xf32, #tpu.memory_space<vmem>>, vector<1x4x1xf32>
    %84 = vector.shape_cast %83 : vector<1x4x1xf32> to vector<4x1xf32>
    %85 = vector.shape_cast %82 : vector<4x1xf32> to vector<1x4x1xf32>
    tpu.vector_store %arg9[%c0_45, %c0_46, %c0_47], %85 {strides = array<i32>} : memref<1x4x1xf32, #tpu.memory_space<vmem>>, vector<1x4x1xf32>,
    %86 = arith.truncf %74 : vector<4x256xf32> to vector<4x256xbf16>
    %c0_48 = arith.constant 0 : index
    %c0_49 = arith.constant 0 : index
    %c0_50 = arith.constant 0 : index
    %87 = vector.load %arg7[%c0_48, %c0_49, %c0_50] : memref<1x4x256xbf16, #tpu.memory_space<vmem>>, vector<1x4x256xbf16>
    %88 = vector.shape_cast %87 : vector<1x4x256xbf16> to vector<4x256xbf16>
    %89 = vector.shape_cast %86 : vector<4x256xbf16> to vector<1x4x256xbf16>
    tpu.vector_store %arg7[%c0_48, %c0_49, %c0_50], %89 {strides = array<i32>} : memref<1x4x256xbf16, #tpu.memory_space<vmem>>, vector<1x4x256xbf16>,
    return
  }
  func.func @transform_0(%arg0: i32) -> (i32, i32, i32) {
    %c0_i32 = arith.constant 0 : i32
    %c0_i32_0 = arith.constant 0 : i32
    %c0_i32_1 = arith.constant 0 : i32
    return %arg0, %c0_i32, %c0_i32_0 : i32, i32, i32
  }
  func.func @transform_1(%arg0: i32) -> (i32, i32) {
    %c0_i32 = arith.constant 0 : i32
    %c0_i32_0 = arith.constant 0 : i32
    %c0_i32_1 = arith.constant 0 : i32
    return %c0_i32, %c0_i32_0 : i32, i32
  }
  func.func @transform_2(%arg0: i32) -> (i32, i32) {
    %c0_i32 = arith.constant 0 : i32
    %c0_i32_0 = arith.constant 0 : i32
    %c0_i32_1 = arith.constant 0 : i32
    return %c0_i32, %c0_i32_0 : i32, i32
  }
  func.func @transform_3(%arg0: i32) -> (i32, i32, i32) {
    %c0_i32 = arith.constant 0 : i32
    %c0_i32_0 = arith.constant 0 : i32
    %c0_i32_1 = arith.constant 0 : i32
    %c0_i32_2 = arith.constant 0 : i32
    return %c0_i32, %c0_i32_0, %c0_i32_1 : i32, i32, i32
  }
  func.func @transform_4(%arg0: i32) -> (i32, i32) {
    %c0_i32 = arith.constant 0 : i32
    %c0_i32_0 = arith.constant 0 : i32
    %c0_i32_1 = arith.constant 0 : i32
    return %c0_i32, %c0_i32_0 : i32, i32
  }
  func.func @transform_5(%arg0: i32) -> (i32, i32) {
    %c0_i32 = arith.constant 0 : i32
    %c0_i32_0 = arith.constant 0 : i32
    %c0_i32_1 = arith.constant 0 : i32
    return %c0_i32, %c0_i32_0 : i32, i32
  }
  func.func @transform_6(%arg0: i32) -> (i32, i32, i32) {
    %c0_i32 = arith.constant 0 : i32
    %c0_i32_0 = arith.constant 0 : i32
    %c0_i32_1 = arith.constant 0 : i32
    return %arg0, %c0_i32, %c0_i32_0 : i32, i32, i32
  }
  func.func @transform_7(%arg0: i32) -> (i32, i32, i32) {
    %c0_i32 = arith.constant 0 : i32
    %c0_i32_0 = arith.constant 0 : i32
    %c0_i32_1 = arith.constant 0 : i32
    return %arg0, %c0_i32, %c0_i32_0 : i32, i32, i32
  }
  func.func @transform_8(%arg0: i32) -> (i32, i32, i32) {
    %c0_i32 = arith.constant 0 : i32
    %c0_i32_0 = arith.constant 0 : i32
    %c0_i32_1 = arith.constant 0 : i32
    return %arg0, %c0_i32, %c0_i32_0 : i32, i32, i32
  }
}

module attributes {stable_mosaic.version = 11 : i64} {
  func.func @_bn_relu_kernel(%arg0: i32, %arg1: i32, %arg2: memref<8x256xbf16, #tpu.memory_space<vmem>>, %arg3: memref<8x1xf32, #tpu.memory_space<vmem>>, %arg4: memref<8x1xf32, #tpu.memory_space<vmem>>, %arg5: memref<8x256xf32, #tpu.memory_space<vmem>>) attributes {dimension_semantics = [#tpu.dimension_semantics<parallel>, #tpu.dimension_semantics<parallel>], iteration_bounds = array<i64: 1, 1>, scalar_prefetch = 0 : i64, scratch_operands = 0 : i64, tpu.core_type = #tpu.core_type<tc>, window_params = [{transform_indices = @transform_0, window_bounds = array<i64: 8, 256>}, {transform_indices = @transform_1, window_bounds = array<i64: 8, 1>}, {transform_indices = @transform_2, window_bounds = array<i64: 8, 1>}, {transform_indices = @transform_3, window_bounds = array<i64: 8, 256>}]} {
    %c0 = arith.constant 0 : index
    %c0_0 = arith.constant 0 : index
    %0 = vector.load %arg2[%c0, %c0_0] : memref<8x256xbf16, #tpu.memory_space<vmem>>, vector<8x256xbf16>
    %1 = arith.extf %0 : vector<8x256xbf16> to vector<8x256xf32>
    %c0_1 = arith.constant 0 : index
    %c0_2 = arith.constant 0 : index
    %2 = vector.load %arg3[%c0_1, %c0_2] : memref<8x1xf32, #tpu.memory_space<vmem>>, vector<8x1xf32>
    %3 = vector.broadcast %2 : vector<8x1xf32> to vector<8x256xf32>
    %4 = arith.mulf %1, %3 : vector<8x256xf32>
    %c0_3 = arith.constant 0 : index
    %c0_4 = arith.constant 0 : index
    %5 = vector.load %arg4[%c0_3, %c0_4] : memref<8x1xf32, #tpu.memory_space<vmem>>, vector<8x1xf32>
    %6 = vector.broadcast %5 : vector<8x1xf32> to vector<8x256xf32>
    %7 = arith.addf %4, %6 : vector<8x256xf32>
    %cst = arith.constant 0.000000e+00 : f32
    %8 = vector.broadcast %cst : f32 to vector<8x256xf32>
    %9 = arith.maximumf %7, %8 : vector<8x256xf32>
    %c0_5 = arith.constant 0 : index
    %c0_6 = arith.constant 0 : index
    %10 = vector.load %arg5[%c0_5, %c0_6] : memref<8x256xf32, #tpu.memory_space<vmem>>, vector<8x256xf32>
    tpu.vector_store %arg5[%c0_5, %c0_6], %9 {strides = array<i32>} : memref<8x256xf32, #tpu.memory_space<vmem>>, vector<8x256xf32>,
    return
  }
  func.func @transform_0(%arg0: i32, %arg1: i32) -> (i32, i32) {
    %c0_i32 = arith.constant 0 : i32
    return %arg0, %arg1 : i32, i32
  }
  func.func @transform_1(%arg0: i32, %arg1: i32) -> (i32, i32) {
    %c0_i32 = arith.constant 0 : i32
    %c0_i32_0 = arith.constant 0 : i32
    return %arg0, %c0_i32 : i32, i32
  }
  func.func @transform_2(%arg0: i32, %arg1: i32) -> (i32, i32) {
    %c0_i32 = arith.constant 0 : i32
    %c0_i32_0 = arith.constant 0 : i32
    return %arg0, %c0_i32 : i32, i32
  }
  func.func @transform_3(%arg0: i32, %arg1: i32) -> (i32, i32) {
    %c0_i32 = arith.constant 0 : i32
    return %arg0, %arg1 : i32, i32
  }
}

</mosaic_0001>

<bundles_post_ra>
// kernel: up_forward.4
= control target key start
LH: loop header
LB: loop body
LE: loop exit
PB: predicated region body
PF: predicated region fallthrough
CT: control target
= control target key end

     0   :  { %v111_v3 = vmov 0.0   ;;  %vm28_vm0 = vcmask 523264   ;;  %s184_s1 = inlined_call_operand.vmem [shape: f32[64,256], index: 1, kind: input, shape index: {}]   ;;  %s185_s0 = inlined_call_operand.vmem [shape: f32[8,64], index: 0, kind: input, shape index: {}]   ;;  %s186_s2 = inlined_call_operand.vmem [shape: f32[8,256], index: 2, kind: output, shape index: {}]  }
   0x1   :  { %v27_v0 = vld [vmem:[%s184_s1 + $0x78] sm:$0xff]  ;;  %v26_v1 = vld [vmem:[%s184_s1 + $0x70] sm:$0xff]  ;;  %v25_v2 = vld [vmem:[%s184_s1 + $0x68] sm:$0xff]  ;;  %96 = vmatprep.mubr.f32.mxu0 %v111_v3 }
   0x2   :  { %48 = vmatprep.subr.mxu0 %v27_v0  ;;  %v24_v4 = vld [vmem:[%s184_s1 + $0x60] sm:$0xff]  ;;  %v23_v5 = vld [vmem:[%s184_s1 + $0x58] sm:$0xff]  ;;  %v22_v6 = vld [vmem:[%s184_s1 + $0x50] sm:$0xff] }
   0x3   :  { %49 = vmatpush1.msra.mxu0 %v26_v1  ;;  %v21_v7 = vld [vmem:[%s184_s1 + $0x48] sm:$0xff]  ;;  %v20_v8 = vld [vmem:[%s184_s1 + $0x40] sm:$0xff]  ;;  %v19_v9 = vld [vmem:[%s184_s1 + $0x38] sm:$0xff] }
   0x4   :  { %50 = vmatprep.subr.mxu0 %v25_v2  ;;  %v18_v10 = vld [vmem:[%s184_s1 + $0x30] sm:$0xff]  ;;  %v17_v11 = vld [vmem:[%s184_s1 + $0x28] sm:$0xff]  ;;  %v16_v12 = vld [vmem:[%s184_s1 + $0x20] sm:$0xff] }
   0x5   :  { %51 = vmatpush1.msra.mxu0 %v24_v4  ;;  %v15_v13 = vld [vmem:[%s184_s1 + $0x18] sm:$0xff]  ;;  %v14_v14 = vld [vmem:[%s184_s1 + $0x10] sm:$0xff]  ;;  %v13_v15 = vld [vmem:[%s184_s1 + $0x8] sm:$0xff] }
   0x6   :  { %52 = vmatprep.subr.mxu0 %v23_v5  ;;  %v12_v16 = vld [vmem:[%s184_s1] sm:$0xff] }
   0x7   :  { %53 = vmatpush1.msra.mxu0 %v22_v6  ;;  %v11_v17 = vld [vmem:[%s185_s0] sm:$0xff] }
   0x8   :  { %54 = vmatprep.subr.mxu0 %v21_v7 }
   0x9   :  { %55 = vmatpush1.msra.mxu0 %v20_v8 }
   0xa   :  { %56 = vmatprep.subr.mxu0 %v19_v9 }
   0xb   :  { %57 = vmatpush1.msra.mxu0 %v18_v10 }
   0xc   :  { %58 = vmatprep.subr.mxu0 %v17_v11 }
   0xd   :  { %59 = vmatpush1.msra.mxu0 %v16_v12 }
   0xe   :  { %60 = vmatprep.subr.mxu0 %v15_v13 }
   0xf   :  { %61 = vmatpush1.msra.mxu0 %v14_v14 }
  0x10   :  { %62 = vmatprep.subr.mxu0 %v13_v15 }
  0x11   :  { %63 = vmatpush1.msra.mxu0 %v12_v16 }
  0x12   :  { %109 = vmatmul.mubr.msk.f32.vlgmr.msra.gmra.mxu0 %vm28_vm0, %v11_v17 }
  0xd2   :  { %v98_v18 = vpop.f32.mrf.mxu0 }
  0xd3   :  { %103 = vst [vmem:[%s186_s2] sm:$0xff] %v98_v18 }
  0xd4   :  { %v100_v19 = vpop.f32.mrf.mxu0 }
  0xd5   :  { %104 = vst [vmem:[%s186_s2 + $0x8] sm:$0xff] %v100_v19 }

// kernel: tile.13
= control target key start
LH: loop header
LB: loop body
LE: loop exit
PB: predicated region body
PF: predicated region fallthrough
CT: control target
= control target key end

     0   :  { %s22_s0 = inlined_call_operand.vmem [shape: f32[4], index: 0, kind: input, shape index: {}]   ;;  %s23_s1 = inlined_call_operand.vmem [shape: f32[2,4], index: 1, kind: output, shape index: {}]  }
   0x1   :  { %v4_v0 = vld [vmem:[%s22_s0] ss:$0 sm:$0xff] }
   0x2   :  { %5 = vst [vmem:[%s23_s1] sm:$0x3] %v4_v0 }

// kernel: tile.0
= control target key start
LH: loop header
LB: loop body
LE: loop exit
PB: predicated region body
PF: predicated region fallthrough
CT: control target
= control target key end

     0   :  { %s35_s8 = smov 125   ;;  %vm8_vm0 = vcmask 7168   ;;  %s36_s11 = smov 126   ;;  %s62_s0 = inlined_call_operand.vmem [shape: f32[2,4], index: 0, kind: input, shape index: {}]   ;;  %s63_s1 = inlined_call_operand.vmem [shape: f32[8,1], index: 1, kind: output, shape index: {}]  }
   0x1   :  { %v5_v0 = vld [vmem:[%s62_s0] sm:$0x3]  ;;  %s34_s0 = smov 127  }
   0x2   :  { %6 = vst [vmem:[#allocation0] sm:$0x3] %v5_v0 }
   0x9   :  { %v10_v1 = vld [vmem:[#allocation0] sm:$0x3]  }
   0xa   :  { %v22_v2 = vld [vmem:[#allocation0] sm:$0x3]   ;;  %11 = vrot.lane.b32.xlu0 %v10_v1, %s34_s0 }
   0xb   :  { %23 = vrot.lane.b32.xlu1 %v22_v2, %s35_s8  ;;  %v7_v3 = vld [vmem:[#allocation0] sm:$0x3]  }
   0xc   :  { %v16_v4 = vld [vmem:[#allocation0] sm:$0x3]   ;;  %9 = vst.msk [vmem:[%s63_s1] ss:$4 sm:$0x3] %vm8_vm0, %v7_v3  }
   0xe   :  { %17 = vrot.lane.b32.xlu0 %v16_v4, %s36_s11 }
  0x7c   :  { %v12_v5 = vpop.permute.xlu0 %11  }
  0x7d   :  { %v24_v6 = vpop.permute.xlu1 %23   ;;  %28 = vst.msk [vmem:[%s63_s1 + $0x1] ss:$4 sm:$0x3] %vm8_vm0, %v12_v5  }
  0x7e   :  { %30 = vst.msk [vmem:[%s63_s1 + $0x3] ss:$4 sm:$0x3] %vm8_vm0, %v24_v6  }
  0x80   :  { %v18_v7 = vpop.permute.xlu0 %17  }
  0x81   :  { %29 = vst.msk [vmem:[%s63_s1 + $0x2] ss:$4 sm:$0x3] %vm8_vm0, %v18_v7  }

// kernel: up_forward.7
= control target key start
LH: loop header
LB: loop body
LE: loop exit
PB: predicated region body
PF: predicated region fallthrough
CT: control target
= control target key end

     0   :  { %v43_v0 = vmov 0   ;;  %s79_s1 = inlined_call_operand.vmem [shape: f32[8,1], index: 1, kind: input, shape index: {}]   ;;  %s80_s2 = inlined_call_operand.vmem [shape: f32[8,1], index: 2, kind: input, shape index: {}]   ;;  %s81_s0 = inlined_call_operand.vmem [shape: bf16[8,256], index: 0, kind: input, shape index: {}]   ;;  %s82_s3 = inlined_call_operand.vmem [shape: f32[8,256], index: 3, kind: output, shape index: {}]  }
   0x1   :  { %42 = vset.pattern.permute.xlu0 %v43_v0  ;;  %v17_v1 = vld [vmem:[%s79_s1] sm:$0xff] }
   0x2   :  { %20 = vperm.xlu0 %42, %v17_v1   ;;  %v25_v2 = vld [vmem:[%s80_s2] sm:$0xff] }
   0x3   :  { %v14_v3 = vld [vmem:[%s81_s0] sm:$0xff] }
   0x4   :  { %v15_v4 = vunpack.c.l.bf16 %v14_v3  ;;  %v16_v5 = vunpack.c.h.bf16 %v14_v3 }
   0x6   :  { %28 = vperm.xlu0 %42, %v25_v2  }
  0x7d   :  { %v21_v6 = vpop.permute.xlu0 %20 }
  0x7e   :  { %v23_v7 = vmul.f32 %v21_v6, %v15_v4  ;;  %v24_v8 = vmul.f32 %v21_v6, %v16_v5 }
  0x81   :  { %v29_v9 = vpop.permute.xlu0 %28 }
  0x82   :  { %v31_v10 = vadd.f32 %v29_v9, %v23_v7  ;;  %v32_v11 = vadd.f32 %v29_v9, %v24_v8 }
  0x84   :  { %v33_v12 = vmax.f32 %v31_v10, 0.0  ;;  %v34_v13 = vmax.f32 %v32_v11, 0.0 }
  0x86   :  { %35 = vst [vmem:[%s82_s3] sm:$0xff] %v33_v12  ;;  %36 = vst [vmem:[%s82_s3 + $0x8] sm:$0xff] %v34_v13 }

// kernel: up_forward.5
= control target key start
LH: loop header
LB: loop body
LE: loop exit
PB: predicated region body
PF: predicated region fallthrough
CT: control target
= control target key end

     0   :  { %s1372_s27 = smov 0   ;;  %s1531_s0 = inlined_call_operand.vmem [shape: bf16[2,8,290], index: 0, kind: input, shape index: {}]   ;;  %s1532_s1 = inlined_call_operand.vmem [shape: f32[2,256], index: 1, kind: input, shape index: {}]   ;;  %s1533_s2 = inlined_call_operand.vmem [shape: f32[1,290], index: 2, kind: input, shape index: {}]   ;;  %s1534_s3 = inlined_call_operand.vmem [shape: bf16[9,4,8], index: 3, kind: input, shape index: {}]   ;;  %s1535_s4 = inlined_call_operand.vmem [shape: f32[8,1], index: 4, kind: input, shape index: {}]   ;;  %s1536_s5 = inlined_call_operand.vmem [shape: f32[8,1], index: 5, kind: input, shape index: {}]   ;;  %s1537_s6 = inlined_call_operand.vmem [shape: bf16[2,4,290], index: 6, kind: output, shape index: {0}]   ;;  %s1538_s7 = inlined_call_operand.vmem [shape: f32[2,4,1], index: 7, kind: output, shape index: {1}]   ;;  %s1539_s8 = inlined_call_operand.vmem [shape: f32[2,4,1], index: 8, kind: output, shape index: {2}]  }
   0x1 LB: > { %s1213_s2 = sadd.s32 4294967295, %s1309_s27   ;;  %p1217_p0 = scmp.ge.s32.totalorder %s1309_s27, 1  ;;  %s1309_s27 = sphi %s1372_s27, %s19_s27  }
   0x2   : > { %p267_p1 = scmp.lt.s32.totalorder %s1309_s27, 3 }
   0x4   : > { %p268_p2 = pnand %p1217_p0, %p267_p1 }
   0x5   : > { %p309_p3 = scmp.lt.s32.totalorder (!%p268_p2), %s1213_s2, 1  ;;  %s1311_s12 = smov (!%p268_p2), 18  }
   0x6   : > { %271 = sbr.rel (%p268_p2) target bundleno = 652 (0x28c), region = 44  ;;  %s1312_s13 = smov (!%p268_p2), 2  }
   0x7   : > { %s1313_s14 = smov (!%p268_p2), 32   ;;  %s1314_s15 = smov (!%p268_p2), 16  }
   0x8   : > { %s1315_s16 = smov (!%p268_p2), 34   ;;  %s1316_s17 = smov (!%p268_p2), 127  }
   0x9   : > { %s1317_s18 = smov (!%p268_p2), 111   ;;  %s1319_s21 = smov (!%p268_p2), 126  }
   0xa   : > { %s1320_s22 = smov (!%p268_p2), 96   ;;  %s1321_s23 = smov (!%p268_p2), 112  }
   0xb   : > { %v332_v0 = vlaneseq  ;;  %v1222_v2 = vld [vmem:[%s1532_s1 + $0x1] ss:$2 sm:$0x3]  ;;  %v330_v3 = vld [vmem:[%s1532_s1] ss:$2 sm:$0x3] }
   0xc   : > { %s1541_s2 = smov (!%p309_p3, %s1213_s2), 1  ;;  %vm404_vm0 = vcmask 1043456   ;;  %v1318_v32 = vmov 0   ;;  %vm400_vm1 = vcmask 64512   ;;  %v380_v36 = vld [vmem:[%s1534_s3] sm:$0x3] }
   0xd   : > { %v1380_v1 = vshrl.u32 %v332_v0, 7  ;;  %s1274_s30 = smul.u32 12, %s1541_s2  ;;  %443 = vmatprep.mubr.bf16.mxu0 %v1318_v32  ;;  %498 = vmatprep.mubr.bf16.mxu1 %v1318_v32  ;;  %vm529_vm2 = vcmask 15360   ;;  %vm609_vm3 = vcmask 130048   ;;  %vm397_vm4 = vcmask 1039360   ;;  %s1322_s24 = smov 110  }
   0xe   : > { %vm752_vm5 = vcmask 146432   ;;  %vm832_vm6 = vcmask 261120   ;;  %vm975_vm7 = vcmask 277504   ;;  %s1323_s4 = smov 95   ;;  %s1324_s5 = smov 94   ;;  %vm631_vm8 = vcmask 916480  }
   0xf   : > { %v334_v4 = vsub.s32 0, %v1380_v1  ;;  %v338_v5 = vsub.s32 1, %v1380_v1  ;;  %s313_s11 = scalar_lea.vmem %s1531_s0, %s1274_s30  ;;  %vm551_vm9 = vcmask 1031168   ;;  %vm694_vm10 = vcmask 908288   ;;  %s1275_s20 = smul.u32 6, %s1541_s2 }
  0x10   : > { %v1396_v24 = vld [vmem:[%s313_s11] sm:$0xff]  ;;  %v1402_v26 = vld [vmem:[%s313_s11 + $0x8] sm:$0xf]  ;;  %vm774_vm11 = vcmask 900096   ;;  %vm854_vm12 = vcmask 785408   ;;  %vm917_vm13 = vcmask 777216  }
  0x11   : > { %v350_v6 = vrot.slane %v1222_v2, %v334_v4  ;;  %v354_v7 = vrot.slane %v1222_v2, %v338_v5  ;;  %v335_v8 = vrot.slane %v330_v3, %v334_v4  ;;  %v339_v9 = vrot.slane %v330_v3, %v338_v5  ;;  %v1224_v2 = vld [vmem:[%s1534_s3 + $0x2] sm:$0x3]  ;;  %s1220_s25 = sshll.u32 %s1541_s2, 2 }
  0x12   : > { %v1400_v25 = vcombine.low %v1396_v24, %v1396_v24  ;;  %v1406_v27 = vcombine.high %v1396_v24, %v1396_v24  ;;  %v1411_v28 = vcombine.low %v1402_v26, %v1402_v26  ;;  %vm997_vm14 = vcmask 769024   ;;  %s326_s30 = scalar_lea.vmem %s1539_s8, %s1220_s25 }
  0x13   : > { %v357_v10 = vpack.c.bf16 %v350_v6, %v350_v6  ;;  %v358_v11 = vpack.c.bf16 %v354_v7, %v354_v7  ;;  %v342_v12 = vpack.c.bf16 %v335_v8, %v335_v8  ;;  %v343_v13 = vpack.c.bf16 %v339_v9, %v339_v9 }
  0x14   : > { %vm1067_vm15 = vcmask 1041408  }
  0x15   : > { %v508_v14 = vpack.i.b16 %v357_v10, %v357_v10  ;;  %v515_v15 = vpack.i.b16 %v358_v11, %v358_v11  ;;  %v360_v16 = vpack.i.b16 %v342_v12, %v342_v12  ;;  %v367_v17 = vpack.i.b16 %v343_v13, %v343_v13 }
  0x17   : > { %v513_v18 = vrot.slane %v508_v14, %v334_v4  ;;  %v520_v19 = vrot.slane %v515_v15, %v334_v4  ;;  %v365_v20 = vrot.slane %v360_v16, %v334_v4  ;;  %v372_v21 = vrot.slane %v367_v17, %v334_v4 }
  0x19   : > { %v1234_v22 = vcombine.low %v513_v18, %v520_v19  ;;  %v1223_v23 = vcombine.low %v365_v20, %v372_v21 }
  0x1b   : > { %749 = vrot.lane.b32.xlu1 %v1234_v22, %s1311_s12  ;;  %526 = vrot.lane.b32.xlu0 %v1234_v22, %s1312_s13  ;;  %v379_v29 = vmul.bf16 %v1223_v23, %v1396_v24 }
  0x1d   : > { %v1231_v30 = vcombine.high %v379_v29, %v379_v29  ;;  %v1230_v31 = vcombine.low %v379_v29, %v379_v29 }
  0x1f   : > { %829 = vrot.lane.b32.xlu1 %v1223_v23, %s1313_s14  ;;  %606 = vrot.lane.b32.xlu0 %v1223_v23, %s1314_s15  ;;  %v461_v33 = vsel %vm404_vm0, %v1230_v31, 0 }
  0x20   : > { %1232 = vmatprep.subr.msk.bf16.mxu1 %vm404_vm0, %v1231_v30 }
  0x21   : > { %481 = vmatpush1.bf16.msra.mxu1 %v461_v33 }
  0x23   : > { %972 = vrot.lane.b32.xlu0 %v1234_v22, %s1315_s16  ;;  %391 = vrot.lane.b32.xlu1 %v1400_v25, %s1316_s17 }
  0x24   : > { %1233 = vmatmul.mubr.msk.bf16.vlgmr.msra.gmra.mxu1 %vm400_vm1, %v380_v36  ;;  %v1235_v36 = vld [vmem:[%s1534_s3 + $0x4] sm:$0x3] }
  0x25   : > { %675 = vmatprep.mubr.bf16.mxu1 %v1318_v32 }
  0x27   : > { %393 = vrot.lane.b32.xlu0 %v1406_v27, %s1316_s17  ;;  %395 = vrot.lane.b32.xlu1 %v1411_v28, %s1316_s17 }
  0x2b   : > { %688 = vrot.lane.b32.xlu0 %v1400_v25, %s1317_s18  ;;  %690 = vrot.lane.b32.xlu1 %v1406_v27, %s1317_s18 }
  0x2f   : > { %692 = vrot.lane.b32.xlu0 %v1411_v28, %s1317_s18 }
  0x8d   : > { %v750_v34 = vpop.permute.xlu1 %749  ;;  %v527_v35 = vpop.permute.xlu0 %526 }
  0x8e   : > { %v528_v37 = vrot.slane %v527_v35, 4  ;;  %v751_v44 = vrot.slane %v750_v34, 4 }
  0x90   : > { %v534_v38 = vmul.bf16 %v528_v37, %v1402_v26  ;;  %v530_v45 = vsel %vm529_vm2, %v528_v37, %v527_v35  ;;  %v757_v48 = vmul.bf16 %v751_v44, %v1402_v26  ;;  %v753_v3 = vsel %vm752_vm5, %v751_v44, %v750_v34 }
  0x91   : > { %v830_v39 = vpop.permute.xlu1 %829  ;;  %v607_v40 = vpop.permute.xlu0 %606  ;;  %v533_v51 = vmul.bf16 %v530_v45, %v1396_v24  ;;  %v756_v5 = vmul.bf16 %v753_v3, %v1396_v24  ;;  %vm1070_vm2 = vcmask 275460   ;;  %vm1091_vm5 = vcmask 1041544  }
  0x92   : > { %v831_v41 = vrot.slane %v830_v39, 4  ;;  %v608_v42 = vrot.slane %v607_v40, 4  ;;  %v1238_v43 = vcombine.low %v534_v38, %v534_v38  ;;  %v1253_v55 = vcombine.low %v757_v48, %v757_v48 }
  0x93   : > { %v1236_v59 = vcombine.low %v533_v51, %v533_v51  ;;  %v1237_v0 = vcombine.high %v533_v51, %v533_v51  ;;  %v1252_v10 = vcombine.high %v756_v5, %v756_v5  ;;  %v1251_v13 = vcombine.low %v756_v5, %v756_v5  ;;  %v1250_v51 = vld [vmem:[%s1534_s3 + $0xa] sm:$0x3]  ;;  %v1265_v5 = vld [vmem:[%s1534_s3 + $0x10] sm:$0x3] }
  0x94   : > { %v837_v46 = vmul.bf16 %v831_v41, %v1402_v26  ;;  %v614_v47 = vmul.bf16 %v608_v42, %v1402_v26  ;;  %549 = vrot.lane.b32.xlu0 %v1238_v43, %s1319_s21  ;;  %v610_v54 = vsel %vm609_vm3, %v608_v42, %v607_v40  ;;  %v833_v7 = vsel %vm832_vm6, %v831_v41, %v830_v39  ;;  %v1241_v42 = vld [vmem:[%s1534_s3 + $0x6] sm:$0x3] }
  0x95   : > { %v973_v49 = vpop.permute.xlu0 %972  ;;  %v392_v50 = vpop.permute.xlu1 %391  ;;  %v613_v58 = vmul.bf16 %v610_v54, %v1396_v24  ;;  %v836_v9 = vmul.bf16 %v833_v7, %v1396_v24 }
  0x96   : > { %v1259_v52 = vcombine.low %v837_v46, %v837_v46  ;;  %v1244_v53 = vcombine.low %v614_v47, %v614_v47  ;;  %v974_v4 = vrot.slane %v973_v49, 4  ;;  %v1247_v46 = vld [vmem:[%s1534_s3 + $0x8] sm:$0x3] }
  0x97   : > { %v1243_v63 = vcombine.high %v613_v58, %v613_v58  ;;  %v1242_v6 = vcombine.low %v613_v58, %v613_v58  ;;  %v1257_v12 = vcombine.low %v836_v9, %v836_v9  ;;  %v1258_v16 = vcombine.high %v836_v9, %v836_v9  ;;  %v1256_v58 = vld [vmem:[%s1534_s3 + $0xc] sm:$0x3] }
  0x98   : > { %852 = vrot.lane.b32.xlu0 %v1259_v52, %s1320_s22  ;;  %629 = vrot.lane.b32.xlu1 %v1244_v53, %s1321_s23  ;;  %v976_v8 = vsel %vm975_vm7, %v974_v4, %v973_v49  ;;  %v980_v14 = vmul.bf16 %v974_v4, %v1402_v26  ;;  %vm1093_vm7 = vcmask 136196  }
  0x99   : > { %v394_v56 = vpop.permute.xlu0 %393  ;;  %v396_v57 = vpop.permute.xlu1 %395  ;;  %v979_v11 = vmul.bf16 %v976_v8, %v1396_v24 }
  0x9a   : > { %v399_v60 = vsel %vm397_vm4, %v394_v56, %v396_v57  ;;  %v398_v61 = vsel %vm397_vm4, %v392_v50, %v394_v56  ;;  %v1268_v17 = vcombine.low %v980_v14, %v980_v14 }
  0x9b   : > { %1228 = vmatprep.subr.msk.bf16.mxu0 %vm404_vm0, %v399_v60  ;;  %v406_v62 = vsel %vm404_vm0, %v398_v61, 0  ;;  %v1266_v15 = vcombine.low %v979_v11, %v979_v11  ;;  %v1267_v18 = vcombine.high %v979_v11, %v979_v11 }
  0x9c   : > { %545 = vrot.lane.b32.xlu0 %v1236_v59, %s1319_s21  ;;  %772 = vrot.lane.b32.xlu1 %v1253_v55, %s1322_s24 }
  0x9d   : > { %426 = vmatpush1.bf16.msra.mxu0 %v406_v62  ;;  %v689_v19 = vpop.permute.xlu0 %688  ;;  %v691_v21 = vpop.permute.xlu1 %690  ;;  %v1262_v62 = vld [vmem:[%s1534_s3 + $0xe] sm:$0x3] }
  0x9e   : > { %v695_v34 = vsel %vm694_vm10, %v689_v19, %v691_v21 }
  0x9f   : > { %v701_v40 = vsel %vm404_vm0, %v695_v34, 0 }
  0xa0   : > { %627 = vrot.lane.b32.xlu0 %v1243_v63, %s1321_s23  ;;  %547 = vrot.lane.b32.xlu1 %v1237_v0, %s1319_s21 }
  0xa1   : > { %1229 = vmatmul.mubr.msk.bf16.vlgmr.msra.gmra.mxu0 %vm400_vm1, %v1224_v2  ;;  %v693_v20 = vpop.permute.xlu0 %692 }
  0xa2   : > { %595 = vmatprep.mubr.bf16.mxu0 %v1318_v32  ;;  %v696_v35 = vsel %vm694_vm10, %v691_v21, %v693_v20 }
  0xa4   : > { %913 = vrot.lane.b32.xlu0 %v1406_v27, %s1323_s4  ;;  %625 = vrot.lane.b32.xlu1 %v1242_v6, %s1321_s23  ;;  %s318_s23 = scalar_lea.vmem %s1537_s6, %s1275_s20 }
  0xa8   : > { %770 = vrot.lane.b32.xlu0 %v1252_v10, %s1322_s24  ;;  %911 = vrot.lane.b32.xlu1 %v1400_v25, %s1323_s4 }
  0xac   : > { %848 = vrot.lane.b32.xlu0 %v1257_v12, %s1320_s22  ;;  %768 = vrot.lane.b32.xlu1 %v1251_v13, %s1322_s24  ;;  %s1326_s24 = smov 17  }
  0xb0   : > { %991 = vrot.lane.b32.xlu0 %v1266_v15, %s1324_s5  ;;  %850 = vrot.lane.b32.xlu1 %v1258_v16, %s1320_s22 }
  0xb4   : > { %995 = vrot.lane.b32.xlu0 %v1268_v17, %s1324_s5  ;;  %915 = vrot.lane.b32.xlu1 %v1411_v28, %s1323_s4 }
  0xb8   : > { %993 = vrot.lane.b32.xlu1 %v1267_v18, %s1324_s5  ;;  %s322_s5 = scalar_lea.vmem %s1538_s7, %s1220_s25 }
  0xe4   : > { %v500_v6 = vpop.f32.mrf.mxu1 }
  0xe6   : > { %v502_v7 = vpop.f32.mrf.mxu1 }
  0xe8   : > { %v504_v8 = vpop.f32.mrf.mxu1 }
  0xea   : > { %v505_v9 = vpop.f32.mrf.mxu1 }
 0x106   : > { %v550_v22 = vpop.permute.xlu0 %549 }
 0x10a   : > { %v853_v23 = vpop.permute.xlu0 %852  ;;  %v630_v24 = vpop.permute.xlu1 %629 }
 0x10e   : > { %v546_v25 = vpop.permute.xlu0 %545  ;;  %v773_v26 = vpop.permute.xlu1 %772 }
 0x112   : > { %v628_v27 = vpop.permute.xlu0 %627  ;;  %v548_v29 = vpop.permute.xlu1 %547 }
 0x113   : > { %v633_v30 = vsel %vm631_vm8, %v628_v27, %v630_v24  ;;  %v552_v31 = vsel %vm551_vm9, %v546_v25, %v548_v29  ;;  %v553_v33 = vsel %vm551_vm9, %v548_v29, %v550_v22 }
 0x114   : > { %v558_v28 = vsel %vm404_vm0, %v552_v31, 0  ;;  %1239 = vmatprep.subr.msk.bf16.mxu0 %vm404_vm0, %v553_v33  ;;  %1245 = vmatprep.subr.msk.bf16.mxu1 %vm404_vm0, %v633_v30 }
 0x115   : > { %578 = vmatpush1.bf16.msra.mxu0 %v558_v28 }
 0x116   : > { %v914_v37 = vpop.permute.xlu0 %913  ;;  %1248 = vmatprep.subr.msk.bf16.mxu0 %vm404_vm0, %v696_v35  ;;  %v626_v38 = vpop.permute.xlu1 %625 }
 0x117   : > { %v632_v39 = vsel %vm631_vm8, %v626_v38, %v628_v27  ;;  %vm1088_vm8 = vcmask 138240  }
 0x118   : > { %v638_v41 = vsel %vm404_vm0, %v632_v39, 0  ;;  %1240 = vmatmul.mubr.msk.bf16.vlgmr.msra.gmra.mxu0 %vm400_vm1, %v1235_v36 }
 0x119   : > { %658 = vmatpush1.bf16.msra.mxu1 %v638_v41  ;;  %721 = vmatpush1.bf16.msra.mxu0 %v701_v40 }
 0x11a   : > { %v771_v43 = vpop.permute.xlu0 %770  ;;  %v912_v44 = vpop.permute.xlu1 %911  ;;  %738 = vmatprep.mubr.bf16.mxu0 %v1318_v32 }
 0x11b   : > { %v776_v45 = vsel %vm774_vm11, %v771_v43, %v773_v26  ;;  %v918_v57 = vsel %vm917_vm13, %v912_v44, %v914_v37 }
 0x11c   : > { %1246 = vmatmul.mubr.msk.bf16.vlgmr.msra.gmra.mxu1 %vm400_vm1, %v1241_v42  ;;  %1254 = vmatprep.subr.msk.bf16.mxu1 %vm404_vm0, %v776_v45  ;;  %v924_v61 = vsel %vm404_vm0, %v918_v57, 0 }
 0x11d   : > { %818 = vmatprep.mubr.bf16.mxu1 %v1318_v32 }
 0x11e   : > { %v849_v47 = vpop.permute.xlu0 %848  ;;  %v769_v48 = vpop.permute.xlu1 %768 }
 0x11f   : > { %v775_v49 = vsel %vm774_vm11, %v769_v48, %v771_v43 }
 0x120   : > { %v781_v50 = vsel %vm404_vm0, %v775_v49, 0  ;;  %1249 = vmatmul.mubr.msk.bf16.vlgmr.msra.gmra.mxu0 %vm400_vm1, %v1247_v46 }
 0x121   : > { %801 = vmatpush1.bf16.msra.mxu1 %v781_v50  ;;  %898 = vmatprep.mubr.bf16.mxu0 %v1318_v32 }
 0x122   : > { %v851_v52 = vpop.permute.xlu1 %850  ;;  %v992_v55 = vpop.permute.xlu0 %991 }
 0x123   : > { %v855_v53 = vsel %vm854_vm12, %v849_v47, %v851_v52  ;;  %v856_v54 = vsel %vm854_vm12, %v851_v52, %v853_v23 }
 0x124   : > { %v861_v56 = vsel %vm404_vm0, %v855_v53, 0  ;;  %1255 = vmatmul.mubr.msk.bf16.vlgmr.msra.gmra.mxu1 %vm400_vm1, %v1250_v51  ;;  %1260 = vmatprep.subr.msk.bf16.mxu0 %vm404_vm0, %v856_v54 }
 0x125   : > { %881 = vmatpush1.bf16.msra.mxu0 %v861_v56  ;;  %961 = vmatprep.mubr.bf16.mxu1 %v1318_v32 }
 0x126   : > { %v916_v59 = vpop.permute.xlu1 %915  ;;  %v996_v63 = vpop.permute.xlu0 %995 }
 0x127   : > { %v919_v60 = vsel %vm917_vm13, %v914_v37, %v916_v59 }
 0x128   : > { %1261 = vmatmul.mubr.msk.bf16.vlgmr.msra.gmra.mxu0 %vm400_vm1, %v1256_v58  ;;  %1263 = vmatprep.subr.msk.bf16.mxu1 %vm404_vm0, %v919_v60 }
 0x129   : > { %944 = vmatpush1.bf16.msra.mxu1 %v924_v61  ;;  %1041 = vmatprep.mubr.bf16.mxu0 %v1318_v32 }
 0x12a   : > { %v994_v0 = vpop.permute.xlu1 %993 }
 0x12b   : > { %v998_v2 = vsel %vm997_vm14, %v992_v55, %v994_v0  ;;  %v999_v3 = vsel %vm997_vm14, %v994_v0, %v996_v63 }
 0x12c   : > { %v1004_v4 = vsel %vm404_vm0, %v998_v2, 0  ;;  %1264 = vmatmul.mubr.msk.bf16.vlgmr.msra.gmra.mxu1 %vm400_vm1, %v1262_v62  ;;  %1269 = vmatprep.subr.msk.bf16.mxu0 %vm404_vm0, %v999_v3 }
 0x12d   : > { %1024 = vmatpush1.bf16.msra.mxu0 %v1004_v4 }
 0x130   : > { %1270 = vmatmul.mubr.msk.bf16.vlgmr.msra.gmra.mxu0 %vm400_vm1, %v1265_v5  ;;  %v1325_v5 = vmov 1983009808   ;;  %vm1068_vm1 = vcmask 1043458  }
 0x131   : > { %vm1069_vm3 = vmor %vm1068_vm1, %vm1067_vm15 }
 0x132   : > { %vm1071_vm4 = vmor %vm1070_vm2, %vm1069_vm3 }
 0x133   : > { %1072 = vst.msk [vmem:[%s318_s23] sm:$0x3f] %vm1071_vm4, %v1318_v32  ;;  %vm1092_vm6 = vmor %vm1068_vm1, %vm1091_vm5 }
 0x134   : > { %vm1094_vm9 = vmor %vm1093_vm7, %vm1092_vm6 }
 0x161   : > { %v445_v10 = vpop.f32.mrf.mxu0 }
 0x162   : > { %v501_v11 = vadd.f32 %v500_v6, %v445_v10  ;;  %v1079_v6 = vunpack.c.l.s4 %v1325_v5 }
 0x163   : > { %v447_v12 = vpop.f32.mrf.mxu0 }
 0x164   : > { %v503_v13 = vadd.f32 %v502_v7, %v447_v12  ;;  %v1080_v7 = vunpack.c.0.s8 %v1079_v6 }
 0x165   : > { %v449_v14 = vpop.f32.mrf.mxu0 }
 0x166   : > { %v1083_v8 = vsub.s32 %v1080_v7, %v1380_v1 }
 0x167   : > { %v450_v15 = vpop.f32.mrf.mxu0 }
 0x1d8   : > { %v597_v16 = vpop.f32.mrf.mxu0 }
 0x1d9   : > { %v604_v29 = vadd.f32 %v597_v16, %v501_v11 }
 0x1da   : > { %v599_v17 = vpop.f32.mrf.mxu0 }
 0x1db   : > { %v605_v33 = vadd.f32 %v599_v17, %v503_v13 }
 0x1dc   : > { %v601_v18 = vpop.f32.mrf.mxu0  ;;  %v677_v19 = vpop.f32.mrf.mxu1 }
 0x1dd   : > { %v684_v28 = vadd.f32 %v677_v19, %v604_v29 }
 0x1de   : > { %v602_v20 = vpop.f32.mrf.mxu0  ;;  %v679_v21 = vpop.f32.mrf.mxu1 }
 0x1df   : > { %v685_v36 = vadd.f32 %v679_v21, %v605_v33 }
 0x1e0   : > { %v681_v22 = vpop.f32.mrf.mxu1  ;;  %v740_v23 = vpop.f32.mrf.mxu0 }
 0x1e1   : > { %v747_v37 = vadd.f32 %v740_v23, %v684_v28 }
 0x1e2   : > { %v682_v24 = vpop.f32.mrf.mxu1  ;;  %v742_v25 = vpop.f32.mrf.mxu0 }
 0x1e3   : > { %v748_v40 = vadd.f32 %v742_v25, %v685_v36 }
 0x1e4   : > { %v744_v26 = vpop.f32.mrf.mxu0  ;;  %v820_v27 = vpop.f32.mrf.mxu1 }
 0x1e5   : > { %v827_v41 = vadd.f32 %v820_v27, %v747_v37 }
 0x1e6   : > { %v745_v30 = vpop.f32.mrf.mxu0  ;;  %v822_v31 = vpop.f32.mrf.mxu1 }
 0x1e7   : > { %v828_v44 = vadd.f32 %v822_v31, %v748_v40 }
 0x1e8   : > { %v824_v34 = vpop.f32.mrf.mxu1  ;;  %v900_v35 = vpop.f32.mrf.mxu0 }
 0x1e9   : > { %v907_v45 = vadd.f32 %v900_v35, %v827_v41 }
 0x1ea   : > { %v825_v38 = vpop.f32.mrf.mxu1  ;;  %v902_v39 = vpop.f32.mrf.mxu0 }
 0x1eb   : > { %v908_v48 = vadd.f32 %v902_v39, %v828_v44 }
 0x1ec   : > { %v904_v42 = vpop.f32.mrf.mxu0  ;;  %v963_v43 = vpop.f32.mrf.mxu1 }
 0x1ed   : > { %v970_v49 = vadd.f32 %v963_v43, %v907_v45 }
 0x1ee   : > { %v905_v46 = vpop.f32.mrf.mxu0  ;;  %v965_v47 = vpop.f32.mrf.mxu1 }
 0x1ef   : > { %v971_v52 = vadd.f32 %v965_v47, %v908_v48 }
 0x1f0   : > { %v1043_v50 = vpop.f32.mrf.mxu0  ;;  %v967_v51 = vpop.f32.mrf.mxu1 }
 0x1f1   : > { %v1050_v53 = vadd.f32 %v1043_v50, %v970_v49 }
 0x1f2   : > { %v1045_v54 = vpop.f32.mrf.mxu0  ;;  %v968_v55 = vpop.f32.mrf.mxu1 }
 0x1f3   : > { %v1051_v56 = vadd.f32 %v1045_v54, %v971_v52  ;;  %v1059_v57 = vmul.f32 %v1050_v53, %v1050_v53  ;;  %v1052_v60 = vsel %vm404_vm0, %v1050_v53, 0.0 }
 0x1f4   : > { %v1047_v58 = vpop.f32.mrf.mxu0 }
 0x1f5   : > { %v1271_v59 = vpack.c.bf16 %v1051_v56, %v1050_v53  ;;  %v1053_v61 = vsel %vm404_vm0, %v1051_v56, 0.0  ;;  %v1060_v62 = vmul.f32 %v1051_v56, %v1051_v56  ;;  %v1061_v2 = vsel %vm404_vm0, %v1059_v57, 0.0 }
 0x1f6   : > { %v1048_v63 = vpop.f32.mrf.mxu0  ;;  %v1054_v0 = vadd.f32 %v1053_v61, %v1052_v60 }
 0x1f7   : > { %v1062_v3 = vsel %vm404_vm0, %v1060_v62, 0.0  ;;  %v1084_v9 = vrot.slane %v1271_v59, %v1083_v8  ;;  %vm1057_vm0 = vcmask 3072  }
 0x1f8   : > { %1055 = vadd.xlane.f32.xlu1 %v1054_v0  ;;  %v1063_v4 = vadd.f32 %v1062_v3, %v1061_v2 }
 0x1fa   : > { %1064 = vadd.xlane.f32.xlu0 %v1063_v4 }
 0x210   : > { %1085 = vrot.lane.b32.xlu0 %v1084_v9, %s1326_s24 }
 0x281   : > { %v1056_v10 = vpop.xlane.xlu1 %1055 }
 0x282   : > { %1058 = vst.msk [vmem:[%s322_s5] sm:$0xf] %vm1057_vm0, %v1056_v10 }
 0x283   : > { %v1065_v11 = vpop.xlane.xlu0 %1064 }
 0x284   : > { %1066 = vst.msk [vmem:[%s326_s30] sm:$0xf] %vm1057_vm0, %v1065_v11 }
 0x287   : > { %v1086_v1 = vpop.permute.xlu0 %1085 }
 0x288   : > { %v1087_v32 = vrot.slane %v1086_v1, 6 }
 0x28a   : > { %v1089_v12 = vsel %vm1088_vm8, %v1087_v32, %v1086_v1 }
 0x28b   : > { %1095 = vst.msk [vmem:[%s318_s23] sm:$0x3f] %vm1094_vm9, %v1089_v12 }
 0x28c PF: > { %s19_s27 = sadd.s32 1, %s1309_s27  }
 0x28d   : > { %p16_p4 = scmp.ge.s32.totalorder %s19_s27, 4  }
 0x28f   :  { %18 = sbr.rel (!%p16_p4) target bundleno = 1 (0x1), region = 107 }

// kernel: up_forward.6
= control target key start
LH: loop header
LB: loop body
LE: loop exit
PB: predicated region body
PF: predicated region fallthrough
CT: control target
= control target key end

     0   :  { %s1366_s27 = smov 0   ;;  %s1517_s0 = inlined_call_operand.vmem [shape: bf16[2,4,290], index: 0, kind: input, shape index: {}]   ;;  %s1518_s1 = inlined_call_operand.vmem [shape: f32[2,256], index: 1, kind: input, shape index: {}]   ;;  %s1519_s2 = inlined_call_operand.vmem [shape: f32[1,290], index: 2, kind: input, shape index: {}]   ;;  %s1520_s3 = inlined_call_operand.vmem [shape: bf16[9,4,4], index: 3, kind: input, shape index: {}]   ;;  %s1521_s4 = inlined_call_operand.vmem [shape: f32[4,1], index: 4, kind: input, shape index: {}]   ;;  %s1522_s5 = inlined_call_operand.vmem [shape: f32[4,1], index: 5, kind: input, shape index: {}]   ;;  %s1523_s6 = inlined_call_operand.vmem [shape: bf16[2,4,256], index: 6, kind: output, shape index: {0}]   ;;  %s1524_s7 = inlined_call_operand.vmem [shape: f32[2,4,1], index: 7, kind: output, shape index: {1}]   ;;  %s1525_s8 = inlined_call_operand.vmem [shape: f32[2,4,1], index: 8, kind: output, shape index: {2}]  }
   0x1 LB: > { %s1231_s28 = sadd.s32 4294967295, %s1304_s27   ;;  %p1235_p0 = scmp.ge.s32.totalorder %s1304_s27, 1  ;;  %s1304_s27 = sphi %s1366_s27, %s19_s27  }
   0x2   : > { %p267_p1 = scmp.lt.s32.totalorder %s1304_s27, 3 }
   0x4   : > { %p268_p2 = pnand %p1235_p0, %p267_p1 }
   0x5   : > { %s1307_s17 = smov (!%p268_p2), 2   ;;  %s1308_s18 = smov (!%p268_p2), 16  }
   0x6   : > { %271 = sbr.rel (%p268_p2) target bundleno = 656 (0x290), region = 44  ;;  %s1309_s19 = smov (!%p268_p2), 18  }
   0x7   : > { %s1310_s20 = smov (!%p268_p2), 32   ;;  %s1311_s21 = smov (!%p268_p2), 34  }
   0x8   : > { %p309_p3 = scmp.lt.s32.totalorder (!%p268_p2), %s1231_s28, 1  ;;  %s1313_s26 = smov (!%p268_p2), 111  }
   0x9   : > { %s1314_s29 = smov (!%p268_p2), 127   ;;  %s1315_s10 = smov (!%p268_p2), 112  }
   0xa   : > { %s1316_s11 = smov (!%p268_p2), 126   ;;  %s1317_s12 = smov (!%p268_p2), 96  }
   0xb   : > { %v331_v0 = vld [vmem:[%s1521_s4] sm:$0xf]  ;;  %v339_v1 = vlaneseq  ;;  %v1306_v2 = vmov 0   ;;  %s1527_s28 = smov (!%p309_p3, %s1231_s28), 1  ;;  %v1312_v29 = vmov 839922192  }
   0xc   : > { %1297 = vset.pattern.permute.xlu0 %v1306_v2  ;;  %491 = vmatprep.mubr.bf16.mxu0 %v1306_v2  ;;  %v346_v3 = vld [vmem:[%s1522_s5] sm:$0xf]  ;;  %v337_v30 = vunpack.c.l.s4 %v1312_v29  ;;  %s1273_s22 = smul.u32 6, %s1527_s28  ;;  %vm452_vm0 = vcmask 1041408   ;;  %vm448_vm1 = vcmask 31744   ;;  %vm570_vm2 = vcmask 15360  }
   0xd   : > { %334 = vperm.xlu0 %1297, %v331_v0   ;;  %v1382_v4 = vshrl.u32 %v339_v1, 7  ;;  %541 = vmatprep.mubr.bf16.mxu1 %v1306_v2  ;;  %v1241_v5 = vld [vmem:[%s1518_s1 + $0x1] ss:$2 sm:$0x3]  ;;  %vm650_vm3 = vcmask 130048   ;;  %vm791_vm4 = vcmask 146432  }
   0xe   : > { %v388_v6 = vld [vmem:[%s1518_s1] ss:$2 sm:$0x3]  ;;  %v338_v31 = vunpack.c.0.s8 %v337_v30  ;;  %s313_s25 = scalar_lea.vmem %s1517_s0, %s1273_s22  ;;  %s1318_s13 = smov 110   ;;  %vm869_vm5 = vcmask 261120   ;;  %vm1010_vm6 = vcmask 277504  }
   0xf   : > { %v367_v7 = vsub.s32 0, %v1382_v4  ;;  %v371_v8 = vsub.s32 1, %v1382_v4  ;;  %v363_v9 = vld [vmem:[%s1519_s2] sm:$0x7]  ;;  %v375_v41 = vsub.s32 2, %v1382_v4  ;;  %s1319_s14 = smov 95  }
  0x10   : > { %v341_v32 = vsub.s32 %v338_v31, %v1382_v4  ;;  %v328_v33 = vld [vmem:[%s313_s25] sm:$0x3f]  ;;  %s1320_s15 = smov 94   ;;  %vm445_vm7 = vcmask 1039360   ;;  %vm589_vm8 = vcmask 1031168   ;;  %vm732_vm9 = vcmask 908288  }
  0x11   : > { %349 = vperm.xlu0 %1297, %v346_v3   ;;  %v408_v10 = vrot.slane %v1241_v5, %v367_v7  ;;  %v412_v11 = vrot.slane %v1241_v5, %v371_v8  ;;  %v393_v12 = vrot.slane %v388_v6, %v367_v7  ;;  %v397_v13 = vrot.slane %v388_v6, %v371_v8  ;;  %v433_v60 = vld [vmem:[%s1520_s3] sm:$0x3] }
  0x12   : > { %v368_v14 = vrot.slane %v363_v9, %v367_v7  ;;  %v372_v15 = vrot.slane %v363_v9, %v371_v8  ;;  %v329_v35 = vunpack.c.l.bf16 %v328_v33  ;;  %v330_v36 = vunpack.c.h.bf16 %v328_v33 }
  0x13   : > { %v415_v16 = vpack.c.bf16 %v408_v10, %v408_v10  ;;  %v416_v17 = vpack.c.bf16 %v412_v11, %v412_v11  ;;  %v400_v18 = vpack.c.bf16 %v393_v12, %v393_v12  ;;  %v401_v23 = vpack.c.bf16 %v397_v13, %v397_v13 }
  0x14   : > { %v378_v19 = vcombine.low %v368_v14, %v372_v15  ;;  %v376_v45 = vrot.slane %v363_v9, %v375_v41  ;;  %vm669_vm10 = vcmask 916480   ;;  %vm810_vm11 = vcmask 900096  }
  0x15   : > { %v551_v20 = vpack.i.b16 %v415_v16, %v415_v16  ;;  %v558_v21 = vpack.i.b16 %v416_v17, %v416_v17  ;;  %v418_v22 = vpack.i.b16 %v400_v18, %v400_v18  ;;  %v425_v27 = vpack.i.b16 %v401_v23, %v401_v23 }
  0x16   : > { %vm888_vm12 = vcmask 785408   ;;  %vm951_vm13 = vcmask 777216   ;;  %vm1029_vm14 = vcmask 769024   ;;  %vm1084_vm15 = vcmask 1043456  }
  0x17   : > { %v556_v24 = vrot.slane %v551_v20, %v367_v7  ;;  %v423_v25 = vrot.slane %v418_v22, %v367_v7  ;;  %v563_v26 = vrot.slane %v558_v21, %v367_v7  ;;  %v430_v28 = vrot.slane %v425_v27, %v367_v7 }
  0x19   : > { %566 = vrot.lane.b32.xlu1 %v556_v24, %s1307_s17  ;;  %646 = vrot.lane.b32.xlu0 %v423_v25, %s1308_s18 }
  0x1d   : > { %568 = vrot.lane.b32.xlu1 %v563_v26, %s1307_s17  ;;  %787 = vrot.lane.b32.xlu0 %v556_v24, %s1309_s19 }
  0x21   : > { %648 = vrot.lane.b32.xlu1 %v430_v28, %s1308_s18  ;;  %865 = vrot.lane.b32.xlu0 %v423_v25, %s1310_s20 }
  0x25   : > { %789 = vrot.lane.b32.xlu1 %v563_v26, %s1309_s19  ;;  %1006 = vrot.lane.b32.xlu0 %v556_v24, %s1311_s21 }
  0x29   : > { %867 = vrot.lane.b32.xlu1 %v430_v28, %s1310_s20 }
  0x2d   : > { %1008 = vrot.lane.b32.xlu1 %v563_v26, %s1311_s21 }
  0x88   : > { %v335_v34 = vpop.permute.xlu0 %334 }
  0x89   : > { %v342_v37 = vrot.slane %v335_v34, %v341_v32  ;;  %v1242_v34 = vld [vmem:[%s1520_s3 + $0x2] sm:$0x3] }
  0x8b   : > { %v344_v39 = vmul.f32 %v342_v37, %v329_v35  ;;  %v345_v40 = vmul.f32 %v342_v37, %v330_v36  ;;  %v567_v49 = vpop.permute.xlu1 %566 }
  0x8c   : > { %v350_v38 = vpop.permute.xlu0 %349 }
  0x8d   : > { %v357_v42 = vrot.slane %v350_v38, %v341_v32 }
  0x8f   : > { %v359_v43 = vadd.f32 %v357_v42, %v344_v39  ;;  %v360_v44 = vadd.f32 %v357_v42, %v345_v40  ;;  %v569_v58 = vpop.permute.xlu1 %568 }
  0x90   : > { %v647_v56 = vpop.permute.xlu0 %646  ;;  %v571_v5 = vsel %vm570_vm2, %v567_v49, %v569_v58 }
  0x91   : > { %v361_v46 = vmax.f32 %v359_v43, 0.0  ;;  %v362_v47 = vmax.f32 %v360_v44, 0.0 }
  0x93   : > { %v380_v48 = vmul.f32 %v378_v19, %v361_v46  ;;  %v381_v50 = vmul.f32 %v376_v45, %v362_v47  ;;  %v649_v63 = vpop.permute.xlu1 %648  ;;  %v1247_v47 = vld [vmem:[%s1520_s3 + $0x4] sm:$0x3] }
  0x94   : > { %v788_v62 = vpop.permute.xlu0 %787  ;;  %v651_v9 = vsel %vm650_vm3, %v647_v56, %v649_v63 }
  0x95   : > { %v383_v51 = vcombine.high %v380_v48, %v380_v48  ;;  %v1408_v52 = vpack.c.bf16 %v380_v48, %v380_v48  ;;  %v1416_v55 = vpack.c.bf16 %v381_v50, %v381_v50 }
  0x97   : > { %v1410_v53 = vpack.c.bf16 %v383_v51, %v383_v51  ;;  %726 = vrot.lane.b32.xlu1 %v1408_v52, %s1313_s26  ;;  %439 = vrot.lane.b32.xlu0 %v1408_v52, %s1314_s29  ;;  %v431_v54 = vmul.bf16 %v423_v25, %v1408_v52  ;;  %v655_v61 = vmul.bf16 %v647_v56, %v1408_v52  ;;  %v790_v6 = vpop.permute.xlu1 %789 }
  0x98   : > { %v575_v0 = vmul.bf16 %v567_v49, %v1408_v52  ;;  %v657_v1 = vmul.bf16 %v649_v63, %v1416_v55  ;;  %v577_v3 = vmul.bf16 %v569_v58, %v1416_v55  ;;  %v866_v4 = vpop.permute.xlu0 %865  ;;  %v796_v11 = vmul.bf16 %v788_v62, %v1408_v52 }
  0x99   : > { %v432_v57 = vmul.bf16 %v430_v28, %v1410_v53  ;;  %v504_v59 = vsel %vm452_vm0, %v431_v54, 0  ;;  %v874_v7 = vmul.bf16 %v866_v4, %v1408_v52  ;;  %v576_v8 = vmul.bf16 %v571_v5, %v1410_v53 }
  0x9a   : > { %v656_v10 = vmul.bf16 %v651_v9, %v1410_v53  ;;  %v792_v14 = vsel %vm791_vm4, %v788_v62, %v790_v6  ;;  %v798_v15 = vmul.bf16 %v790_v6, %v1416_v55  ;;  %v1256_v62 = vld [vmem:[%s1520_s3 + $0xa] sm:$0x3] }
  0x9b   : > { %730 = vrot.lane.b32.xlu1 %v1416_v55, %s1313_s26  ;;  %443 = vrot.lane.b32.xlu0 %v1416_v55, %s1314_s29  ;;  %v868_v12 = vpop.permute.xlu1 %867  ;;  %v797_v16 = vmul.bf16 %v792_v14, %v1410_v53 }
  0x9c   : > { %1245 = vmatprep.subr.msk.bf16.mxu1 %vm452_vm0, %v432_v57  ;;  %v876_v13 = vmul.bf16 %v868_v12, %v1416_v55  ;;  %v870_v17 = vsel %vm869_vm5, %v866_v4, %v868_v12  ;;  %v1007_v19 = vpop.permute.xlu0 %1006  ;;  %v1253_v57 = vld [vmem:[%s1520_s3 + $0x8] sm:$0x3]  ;;  %v1262_v12 = vld [vmem:[%s1520_s3 + $0xe] sm:$0x3] }
  0x9d   : > { %524 = vmatpush1.bf16.msra.mxu1 %v504_v59  ;;  %v875_v18 = vmul.bf16 %v870_v17, %v1410_v53  ;;  %v1015_v21 = vmul.bf16 %v1007_v19, %v1408_v52  ;;  %v1265_v17 = vld [vmem:[%s1520_s3 + $0x10] sm:$0x3] }
  0x9f   : > { %441 = vrot.lane.b32.xlu1 %v1410_v53, %s1314_s29  ;;  %663 = vrot.lane.b32.xlu0 %v655_v61, %s1315_s10  ;;  %v1009_v20 = vpop.permute.xlu1 %1008 }
  0xa0   : > { %1246 = vmatmul.mubr.msk.bf16.vlgmr.msra.gmra.mxu1 %vm448_vm1, %v433_v60  ;;  %v1011_v22 = vsel %vm1010_vm6, %v1007_v19, %v1009_v20  ;;  %v1017_v23 = vmul.bf16 %v1009_v20, %v1416_v55 }
  0xa1   : > { %713 = vmatprep.mubr.bf16.mxu1 %v1306_v2  ;;  %v1016_v24 = vmul.bf16 %v1011_v22, %v1410_v53 }
  0xa3   : > { %583 = vrot.lane.b32.xlu1 %v575_v0, %s1316_s11  ;;  %667 = vrot.lane.b32.xlu0 %v657_v1, %s1315_s10 }
  0xa7   : > { %587 = vrot.lane.b32.xlu1 %v577_v3, %s1316_s11  ;;  %728 = vrot.lane.b32.xlu0 %v1410_v53, %s1313_s26 }
  0xab   : > { %882 = vrot.lane.b32.xlu1 %v874_v7, %s1317_s12  ;;  %585 = vrot.lane.b32.xlu0 %v576_v8, %s1316_s11  ;;  %v1259_v7 = vld [vmem:[%s1520_s3 + $0xc] sm:$0x3] }
  0xaf   : > { %665 = vrot.lane.b32.xlu1 %v656_v10, %s1315_s10  ;;  %804 = vrot.lane.b32.xlu0 %v796_v11, %s1318_s13 }
  0xb3   : > { %886 = vrot.lane.b32.xlu1 %v876_v13, %s1317_s12  ;;  %808 = vrot.lane.b32.xlu0 %v798_v15, %s1318_s13 }
  0xb7   : > { %806 = vrot.lane.b32.xlu1 %v797_v16, %s1318_s13  ;;  %945 = vrot.lane.b32.xlu0 %v1408_v52, %s1319_s14 }
  0xbb   : > { %947 = vrot.lane.b32.xlu1 %v1410_v53, %s1319_s14  ;;  %884 = vrot.lane.b32.xlu0 %v875_v18, %s1317_s12  ;;  %v1250_v53 = vld [vmem:[%s1520_s3 + $0x6] sm:$0x3]  ;;  %s1272_s12 = sshll.u32 %s1527_s28, 2 }
  0xbc   : > { %s322_s17 = scalar_lea.vmem %s1524_s7, %s1272_s12  ;;  %s326_s20 = scalar_lea.vmem %s1525_s8, %s1272_s12 }
  0xbf   : > { %1023 = vrot.lane.b32.xlu1 %v1015_v21, %s1320_s15  ;;  %949 = vrot.lane.b32.xlu0 %v1416_v55, %s1319_s14 }
  0xc3   : > { %1027 = vrot.lane.b32.xlu1 %v1017_v23, %s1320_s15  ;;  %1025 = vrot.lane.b32.xlu0 %v1016_v24, %s1320_s15  ;;  %s318_s15 = scalar_lea.vmem %s1523_s6, %s1272_s12 }
 0x109   : > { %v727_v25 = vpop.permute.xlu1 %726  ;;  %v440_v26 = vpop.permute.xlu0 %439 }
 0x10d   : > { %v731_v27 = vpop.permute.xlu1 %730  ;;  %v444_v28 = vpop.permute.xlu0 %443 }
 0x111   : > { %v442_v29 = vpop.permute.xlu1 %441  ;;  %v664_v30 = vpop.permute.xlu0 %663 }
 0x112   : > { %v447_v31 = vsel %vm445_vm7, %v442_v29, %v444_v28  ;;  %v446_v32 = vsel %vm445_vm7, %v440_v26, %v442_v29 }
 0x113   : > { %1243 = vmatprep.subr.msk.bf16.mxu0 %vm452_vm0, %v447_v31  ;;  %v454_v33 = vsel %vm452_vm0, %v446_v32, 0 }
 0x114   : > { %474 = vmatpush1.bf16.msra.mxu0 %v454_v33 }
 0x115   : > { %v584_v35 = vpop.permute.xlu1 %583  ;;  %v668_v36 = vpop.permute.xlu0 %667 }
 0x117   : > { %1244 = vmatmul.mubr.msk.bf16.vlgmr.msra.gmra.mxu0 %vm448_vm1, %v1242_v34 }
 0x118   : > { %633 = vmatprep.mubr.bf16.mxu0 %v1306_v2 }
 0x119   : > { %v588_v37 = vpop.permute.xlu1 %587  ;;  %v729_v38 = vpop.permute.xlu0 %728 }
 0x11a   : > { %v733_v44 = vsel %vm732_vm9, %v727_v25, %v729_v38  ;;  %v734_v45 = vsel %vm732_vm9, %v729_v38, %v731_v27 }
 0x11b   : > { %v739_v52 = vsel %vm452_vm0, %v733_v44, 0 }
 0x11d   : > { %v883_v39 = vpop.permute.xlu1 %882  ;;  %v586_v40 = vpop.permute.xlu0 %585 }
 0x11e   : > { %v590_v41 = vsel %vm589_vm8, %v584_v35, %v586_v40  ;;  %v591_v42 = vsel %vm589_vm8, %v586_v40, %v588_v37 }
 0x11f   : > { %v596_v43 = vsel %vm452_vm0, %v590_v41, 0  ;;  %1248 = vmatprep.subr.msk.bf16.mxu0 %vm452_vm0, %v591_v42 }
 0x120   : > { %616 = vmatpush1.bf16.msra.mxu0 %v596_v43 }
 0x121   : > { %v666_v46 = vpop.permute.xlu1 %665  ;;  %1254 = vmatprep.subr.msk.bf16.mxu0 %vm452_vm0, %v734_v45  ;;  %v805_v50 = vpop.permute.xlu0 %804 }
 0x122   : > { %v670_v48 = vsel %vm669_vm10, %v664_v30, %v666_v46  ;;  %v671_v49 = vsel %vm669_vm10, %v666_v46, %v668_v36 }
 0x123   : > { %v676_v51 = vsel %vm452_vm0, %v670_v48, 0  ;;  %1251 = vmatprep.subr.msk.bf16.mxu1 %vm452_vm0, %v671_v49  ;;  %1249 = vmatmul.mubr.msk.bf16.vlgmr.msra.gmra.mxu0 %vm448_vm1, %v1247_v47 }
 0x124   : > { %696 = vmatpush1.bf16.msra.mxu1 %v676_v51  ;;  %759 = vmatpush1.bf16.msra.mxu0 %v739_v52 }
 0x125   : > { %v887_v54 = vpop.permute.xlu1 %886  ;;  %776 = vmatprep.mubr.bf16.mxu0 %v1306_v2  ;;  %v809_v55 = vpop.permute.xlu0 %808 }
 0x127   : > { %1252 = vmatmul.mubr.msk.bf16.vlgmr.msra.gmra.mxu1 %vm448_vm1, %v1250_v53 }
 0x128   : > { %854 = vmatprep.mubr.bf16.mxu1 %v1306_v2 }
 0x129   : > { %v807_v56 = vpop.permute.xlu1 %806  ;;  %v946_v60 = vpop.permute.xlu0 %945 }
 0x12a   : > { %v811_v58 = vsel %vm810_vm11, %v805_v50, %v807_v56  ;;  %v812_v59 = vsel %vm810_vm11, %v807_v56, %v809_v55 }
 0x12b   : > { %v817_v61 = vsel %vm452_vm0, %v811_v58, 0  ;;  %1257 = vmatprep.subr.msk.bf16.mxu1 %vm452_vm0, %v812_v59  ;;  %1255 = vmatmul.mubr.msk.bf16.vlgmr.msra.gmra.mxu0 %vm448_vm1, %v1253_v57 }
 0x12c   : > { %837 = vmatpush1.bf16.msra.mxu1 %v817_v61  ;;  %932 = vmatprep.mubr.bf16.mxu0 %v1306_v2 }
 0x12d   : > { %v948_v63 = vpop.permute.xlu1 %947  ;;  %v885_v0 = vpop.permute.xlu0 %884 }
 0x12e   : > { %v889_v1 = vsel %vm888_vm12, %v883_v39, %v885_v0  ;;  %v890_v3 = vsel %vm888_vm12, %v885_v0, %v887_v54  ;;  %v952_v5 = vsel %vm951_vm13, %v946_v60, %v948_v63 }
 0x12f   : > { %1258 = vmatmul.mubr.msk.bf16.vlgmr.msra.gmra.mxu1 %vm448_vm1, %v1256_v62  ;;  %v895_v4 = vsel %vm452_vm0, %v889_v1, 0  ;;  %1260 = vmatprep.subr.msk.bf16.mxu0 %vm452_vm0, %v890_v3  ;;  %v958_v10 = vsel %vm452_vm0, %v952_v5, 0 }
 0x130   : > { %995 = vmatprep.mubr.bf16.mxu1 %v1306_v2  ;;  %915 = vmatpush1.bf16.msra.mxu0 %v895_v4 }
 0x131   : > { %v1024_v6 = vpop.permute.xlu1 %1023  ;;  %v950_v8 = vpop.permute.xlu0 %949 }
 0x132   : > { %v953_v9 = vsel %vm951_vm13, %v948_v63, %v950_v8 }
 0x133   : > { %1261 = vmatmul.mubr.msk.bf16.vlgmr.msra.gmra.mxu0 %vm448_vm1, %v1259_v7  ;;  %1263 = vmatprep.subr.msk.bf16.mxu1 %vm452_vm0, %v953_v9 }
 0x134   : > { %978 = vmatpush1.bf16.msra.mxu1 %v958_v10  ;;  %1073 = vmatprep.mubr.bf16.mxu0 %v1306_v2 }
 0x135   : > { %v1028_v11 = vpop.permute.xlu1 %1027  ;;  %v1026_v13 = vpop.permute.xlu0 %1025 }
 0x136   : > { %v1030_v14 = vsel %vm1029_vm14, %v1024_v6, %v1026_v13  ;;  %v1031_v15 = vsel %vm1029_vm14, %v1026_v13, %v1028_v11 }
 0x137   : > { %v1036_v16 = vsel %vm452_vm0, %v1030_v14, 0  ;;  %1264 = vmatmul.mubr.msk.bf16.vlgmr.msra.gmra.mxu1 %vm448_vm1, %v1262_v12  ;;  %1266 = vmatprep.subr.msk.bf16.mxu0 %vm452_vm0, %v1031_v15  ;;  %vm1090_vm0 = vcmask 3072  }
 0x138   : > { %1056 = vmatpush1.bf16.msra.mxu0 %v1036_v16 }
 0x13b   : > { %1267 = vmatmul.mubr.msk.bf16.vlgmr.msra.gmra.mxu0 %vm448_vm1, %v1265_v17 }
 0x160   : > { %v543_v18 = vpop.f32.mrf.mxu1 }
 0x162   : > { %v545_v19 = vpop.f32.mrf.mxu1 }
 0x164   : > { %v547_v20 = vpop.f32.mrf.mxu1 }
 0x166   : > { %v548_v2 = vpop.f32.mrf.mxu1 }
 0x1d7   : > { %v493_v21 = vpop.f32.mrf.mxu0 }
 0x1d8   : > { %v544_v35 = vadd.f32 %v543_v18, %v493_v21 }
 0x1d9   : > { %v495_v22 = vpop.f32.mrf.mxu0 }
 0x1da   : > { %v546_v38 = vadd.f32 %v545_v19, %v495_v22 }
 0x1db   : > { %v497_v23 = vpop.f32.mrf.mxu0 }
 0x1dd   : > { %v498_v24 = vpop.f32.mrf.mxu0 }
 0x1e3   : > { %v635_v25 = vpop.f32.mrf.mxu0 }
 0x1e4   : > { %v642_v39 = vadd.f32 %v635_v25, %v544_v35 }
 0x1e5   : > { %v637_v26 = vpop.f32.mrf.mxu0 }
 0x1e6   : > { %v643_v42 = vadd.f32 %v637_v26, %v546_v38 }
 0x1e7   : > { %v715_v27 = vpop.f32.mrf.mxu1  ;;  %v639_v28 = vpop.f32.mrf.mxu0 }
 0x1e8   : > { %v722_v43 = vadd.f32 %v715_v27, %v642_v39 }
 0x1e9   : > { %v717_v29 = vpop.f32.mrf.mxu1  ;;  %v640_v30 = vpop.f32.mrf.mxu0 }
 0x1ea   : > { %v723_v46 = vadd.f32 %v717_v29, %v643_v42 }
 0x1eb   : > { %v719_v31 = vpop.f32.mrf.mxu1  ;;  %v778_v32 = vpop.f32.mrf.mxu0 }
 0x1ec   : > { %v785_v47 = vadd.f32 %v778_v32, %v722_v43 }
 0x1ed   : > { %v720_v33 = vpop.f32.mrf.mxu1  ;;  %v780_v34 = vpop.f32.mrf.mxu0 }
 0x1ee   : > { %v786_v50 = vadd.f32 %v780_v34, %v723_v46 }
 0x1ef   : > { %v856_v36 = vpop.f32.mrf.mxu1  ;;  %v782_v37 = vpop.f32.mrf.mxu0 }
 0x1f0   : > { %v863_v51 = vadd.f32 %v856_v36, %v785_v47 }
 0x1f1   : > { %v858_v40 = vpop.f32.mrf.mxu1  ;;  %v783_v41 = vpop.f32.mrf.mxu0 }
 0x1f2   : > { %v864_v54 = vadd.f32 %v858_v40, %v786_v50 }
 0x1f3   : > { %v860_v44 = vpop.f32.mrf.mxu1  ;;  %v934_v45 = vpop.f32.mrf.mxu0 }
 0x1f4   : > { %v941_v55 = vadd.f32 %v934_v45, %v863_v51 }
 0x1f5   : > { %v861_v48 = vpop.f32.mrf.mxu1  ;;  %v936_v49 = vpop.f32.mrf.mxu0 }
 0x1f6   : > { %v942_v58 = vadd.f32 %v936_v49, %v864_v54 }
 0x1f7   : > { %v938_v52 = vpop.f32.mrf.mxu0  ;;  %v997_v53 = vpop.f32.mrf.mxu1 }
 0x1f8   : > { %v1004_v59 = vadd.f32 %v997_v53, %v941_v55 }
 0x1f9   : > { %v939_v56 = vpop.f32.mrf.mxu0  ;;  %v999_v57 = vpop.f32.mrf.mxu1 }
 0x1fa   : > { %v1005_v62 = vadd.f32 %v999_v57, %v942_v58 }
 0x1fb   : > { %v1075_v60 = vpop.f32.mrf.mxu0  ;;  %v1001_v61 = vpop.f32.mrf.mxu1 }
 0x1fc   : > { %v1082_v63 = vadd.f32 %v1075_v60, %v1004_v59 }
 0x1fd   : > { %v1077_v0 = vpop.f32.mrf.mxu0  ;;  %v1002_v1 = vpop.f32.mrf.mxu1 }
 0x1fe   : > { %v1083_v3 = vadd.f32 %v1077_v0, %v1005_v62  ;;  %v1092_v4 = vmul.f32 %v1082_v63, %v1082_v63  ;;  %v1085_v7 = vsel %vm1084_vm15, %v1082_v63, 0.0 }
 0x1ff   : > { %v1079_v5 = vpop.f32.mrf.mxu0 }
 0x200   : > { %v1268_v6 = vpack.c.bf16 %v1083_v3, %v1082_v63  ;;  %v1086_v8 = vsel %vm1084_vm15, %v1083_v3, 0.0  ;;  %v1093_v9 = vmul.f32 %v1083_v3, %v1083_v3  ;;  %v1094_v12 = vsel %vm1084_vm15, %v1092_v4, 0.0 }
 0x201   : > { %v1080_v10 = vpop.f32.mrf.mxu0  ;;  %v1087_v11 = vadd.f32 %v1086_v8, %v1085_v7 }
 0x202   : > { %v1095_v13 = vsel %vm1084_vm15, %v1093_v9, 0.0  ;;  %1269 = vst.sshfl [vmem:[%s318_s15] sm:$0x33 pattern:$0x76325410] %v1268_v6 }
 0x203   : > { %1088 = vadd.xlane.f32.xlu0 %v1087_v11  ;;  %v1096_v14 = vadd.f32 %v1095_v13, %v1094_v12 }
 0x205   : > { %1097 = vadd.xlane.f32.xlu1 %v1096_v14 }
 0x28c   : > { %v1089_v15 = vpop.xlane.xlu0 %1088 }
 0x28d   : > { %1091 = vst.msk [vmem:[%s322_s17] sm:$0xf] %vm1090_vm0, %v1089_v15 }
 0x28e   : > { %v1098_v16 = vpop.xlane.xlu1 %1097 }
 0x28f   : > { %1099 = vst.msk [vmem:[%s326_s20] sm:$0xf] %vm1090_vm0, %v1098_v16 }
 0x290 PF: > { %s19_s27 = sadd.s32 1, %s1304_s27  }
 0x291   : > { %p16_p4 = scmp.ge.s32.totalorder %s19_s27, 4  }
 0x293   :  { %18 = sbr.rel (!%p16_p4) target bundleno = 1 (0x1), region = 107 }

</bundles_post_ra>
